<compile_context>
chip_gen: v7x
topology: tpu7x:2x2x1
jax: 0.10.0
libtpu: 0.0.40
codegen_flags: <defaults>
</compile_context>

<pallas_src>
import jax
import jax.numpy as jnp
from jax.experimental import pallas as pl
from jax.experimental.pallas import tpu as pltpu

_LANE = 128
# Which row of the (unique) X@W1 slab each view uses: view 0 = original X,
# view 1 = feature-masked X, view 2 = EdgeRemoving (keeps X) -> reuse view 0.
_XW_INDEX = (0, 1, 0)


# ----------------------------- Pallas kernel --------------------------------

def gcn2_views_kernel(a_ref, x_ref, w1_ref, w2_ref,
                      b1_ref, b2_ref, alpha1_ref, alpha2_ref, o_ref):
    """All three views of the 2-layer GCN in one grid step.

    a_ref : [3, Np, Np] bf16   normalized dense adjacency per view
    x_ref : [2*Np, Fp]  bf16   the two *unique* node-feature matrices, stacked
    w1/w2 : [Fp, Hp] / [Hp, Hp] bf16
    b1/b2, alpha1/alpha2 : [1, Hp] f32 (bias rows, PReLU slopes)
    o_ref : [3*Np, Hp] f32
    """
    n_views = a_ref.shape[0]
    np_ = a_ref.shape[1]

    # Layer-1 feature transform, reordered as (X @ W1) and folded over the
    # unique views: one (2*Np, Fp) @ (Fp, Hp) MXU pass.
    xw = jnp.dot(x_ref[...], w1_ref[...],
                 preferred_element_type=jnp.float32).astype(jnp.bfloat16)

    a1 = alpha1_ref[...]          # [1, Hp]
    a2 = alpha2_ref[...]          # [1, Hp]

    # Layer 1 per view: h = prelu(A @ (X W1) + b1)
    hs = []
    for v in range(n_views):
        xw_v = xw[_XW_INDEX[v] * np_:(_XW_INDEX[v] + 1) * np_]          # [Np, Hp]
        h = jnp.dot(a_ref[v], xw_v, preferred_element_type=jnp.float32)
        h = h + b1_ref[...]
        h = jnp.where(h > 0, h, a1 * h)                                  # PReLU
        hs.append(h.astype(jnp.bfloat16))

    # Layer 2: A @ h per view, then fold all views into one @ W2 pass.
    ah = jnp.concatenate(
        [jnp.dot(a_ref[v], hs[v],
                 preferred_element_type=jnp.float32).astype(jnp.bfloat16)
         for v in range(n_views)],
        axis=0)                                                          # [3*Np, Hp]

    z = jnp.dot(ah, w2_ref[...], preferred_element_type=jnp.float32)
    z = z + b2_ref[...]
    z = jnp.where(z > 0, z, a2 * z)                                      # PReLU
    o_ref[...] = z.astype(o_ref.dtype)


def gcn2_all_views(a_views, x_unique, w1, w2, b1, b2, alpha1, alpha2):
    """a_views:[3,Np,Np] bf16, x_unique:[2*Np,Fp] bf16 -> Z:[3,Np,Hp] f32."""
    v, np_, _ = a_views.shape
    unp, fp = x_unique.shape
    hp = w1.shape[1]

    out = pl.pallas_call(
        gcn2_views_kernel,
        out_shape=jax.ShapeDtypeStruct((v * np_, hp), jnp.float32),
        grid_spec=pltpu.PrefetchScalarGridSpec(
            num_scalar_prefetch=0,
            grid=(1,),                    # collapsed: all views in one step
            in_specs=[
                pl.BlockSpec((v, np_, np_), lambda i: (0, 0, 0)),
                pl.BlockSpec((unp, fp), lambda i: (0, 0)),
                pl.BlockSpec((fp, hp), lambda i: (0, 0)),
                pl.BlockSpec((hp, hp), lambda i: (0, 0)),
                pl.BlockSpec((1, hp), lambda i: (0, 0)),
                pl.BlockSpec((1, hp), lambda i: (0, 0)),
                pl.BlockSpec((1, hp), lambda i: (0, 0)),
                pl.BlockSpec((1, hp), lambda i: (0, 0)),
            ],
            out_specs=pl.BlockSpec((v * np_, hp), lambda i: (0, 0)),
        ),
        compiler_params=pltpu.CompilerParams(
            dimension_semantics=("arbitrary",),
            vmem_limit_bytes=32 * 1024 * 1024,   # explicit budget (fits v5e..v7x)
        ),
    )(a_views, x_unique, w1, w2, b1, b2, alpha1, alpha2)
    return out.reshape(v, np_, hp)


# ------------------------------- Glue (JAX) ---------------------------------

def _round_up(v, m):
    return ((v + m - 1) // m) * m


def _pad2(m, rows, cols):
    return jnp.pad(m, ((0, rows - m.shape[0]), (0, cols - m.shape[1])))


def dense_norm_adj(edge_index, edge_weight, num_nodes):
    """Symmetric GCN normalization: D^{-1/2} (A + I) D^{-1/2}.

    Duplicate edges are summed (same as message passing would accumulate them).
    """
    row, col = edge_index[0], edge_index[1]
    a = jnp.zeros((num_nodes, num_nodes), jnp.float32)
    a = a.at[row, col].add(edge_weight)
    a = a + jnp.eye(num_nodes, dtype=jnp.float32)        # add self-loops
    deg = a.sum(axis=1)
    d_inv_sqrt = jnp.where(deg > 0, 1.0 / jnp.sqrt(deg), 0.0)
    return d_inv_sqrt[:, None] * a * d_inv_sqrt[None, :]


def aug_feature_masking(x, edge_index, edge_weight, *, key, pf=0.3):
    """aug1: zero a fraction pf of feature columns (key-deterministic)."""
    keep = (jax.random.uniform(key, (x.shape[1],)) >= pf).astype(x.dtype)
    return x * keep[None, :], edge_index, edge_weight


def aug_edge_removing(x, edge_index, edge_weight, *, key, pe=0.3):
    """aug2: drop a fraction pe of edges by zeroing their weight."""
    keep = (jax.random.uniform(key, edge_weight.shape) >= pe).astype(edge_weight.dtype)
    return x, edge_index, edge_weight * keep


def encoder_forward(x, edge_index, edge_weight, w1, b1, w2, b2,
                    alpha1=0.25, alpha2=0.25, *, aug1_key, aug2_key):
    """Mirrors Encoder.forward: returns (z, z1, z2)."""
    n, f = x.shape
    h = w1.shape[1]
    if edge_weight is None:
        edge_weight = jnp.ones((edge_index.shape[1],), jnp.float32)

    x1, ei1, ew1 = aug_feature_masking(x, edge_index, edge_weight, key=aug1_key)
    x2, ei2, ew2 = aug_edge_removing(x, edge_index, edge_weight, key=aug2_key)

    a0 = dense_norm_adj(edge_index, edge_weight, n)
    a1 = dense_norm_adj(ei1, ew1, n)
    a2 = dense_norm_adj(ei2, ew2, n)

    # Pad everything to lane-dense (multiples of 128) padded shapes.
    np_ = _round_up(n, _LANE)
    fp = _round_up(f, _LANE)
    hp = _round_up(h, _LANE)

    a_views = jnp.stack(
        [_pad2(a0, np_, np_), _pad2(a1, np_, np_), _pad2(a2, np_, np_)],
        axis=0).astype(jnp.bfloat16)                        # [3, Np, Np]
    # Only two unique feature matrices: EdgeRemoving leaves X untouched.
    x_unique = jnp.concatenate(
        [_pad2(x, np_, fp), _pad2(x1, np_, fp)], axis=0).astype(jnp.bfloat16)

    w1p = _pad2(w1, fp, hp).astype(jnp.bfloat16)
    w2p = _pad2(w2, hp, hp).astype(jnp.bfloat16)
    b1p = jnp.pad(b1, (0, hp - h)).reshape(1, hp).astype(jnp.float32)
    b2p = jnp.pad(b2, (0, hp - h)).reshape(1, hp).astype(jnp.float32)
    a1row = jnp.full((1, hp), alpha1, jnp.float32)
    a2row = jnp.full((1, hp), alpha2, jnp.float32)

    z_all = gcn2_all_views(a_views, x_unique, w1p, w2p, b1p, b2p, a1row, a2row)
    z_all = z_all[:, :n, :h]                                # strip padding
    return z_all[0], z_all[1], z_all[2]


def gcn2_ref(a, x, w1, b1, w2, b2, alpha1, alpha2):
    """Pure-JAX f32 reference of one view of the 2-layer GCN."""
    h1 = a @ (x @ w1) + b1
    h1 = jnp.where(h1 > 0, h1, alpha1 * h1)
    z = a @ h1 @ w2 + b2
    return jnp.where(z > 0, z, alpha2 * z)


# --------------------------------- Main --------------------------------------

if __name__ == "__main__":
    N, F, H, E = 16, 32, 32, 48   # nodes, in-features, hidden, edges

    key = jax.random.PRNGKey(0)
    (k_x, k_src, k_dst, k_w1, k_w2,
     k_b1, k_b2, k_a1, k_a2) = jax.random.split(key, 9)

    x = jax.random.normal(k_x, (N, F), jnp.float32)
    edge_index = jnp.stack([
        jax.random.randint(k_src, (E,), 0, N),
        jax.random.randint(k_dst, (E,), 0, N),
    ], axis=0)                                      # [2, E] int32
    edge_weight = None                              # default, as in PyTorch

    # Deterministic GCN parameters (Glorot-ish weights, small biases,
    # PReLU slope 0.25 = torch.nn.PReLU default init).
    w1 = jax.random.normal(k_w1, (F, H), jnp.float32) * (1.0 / jnp.sqrt(F))
    w2 = jax.random.normal(k_w2, (H, H), jnp.float32) * (1.0 / jnp.sqrt(H))
    b1 = jax.random.normal(k_b1, (H,), jnp.float32) * 0.1
    b2 = jax.random.normal(k_b2, (H,), jnp.float32) * 0.1
    alpha1 = alpha2 = 0.25

    z, z1, z2 = encoder_forward(x, edge_index, edge_weight, w1, b1, w2, b2,
                                alpha1, alpha2, aug1_key=k_a1, aug2_key=k_a2)
    jax.block_until_ready((z, z1, z2))

    # Pure-JAX f32 reference (loose tolerance: kernel feeds bf16 to the MXU).
    ew = jnp.ones((E,), jnp.float32)
    x1r, ei1, ew1 = aug_feature_masking(x, edge_index, ew, key=k_a1)
    x2r, ei2, ew2 = aug_edge_removing(x, edge_index, ew, key=k_a2)
    refs = (
        gcn2_ref(dense_norm_adj(edge_index, ew, N), x, w1, b1, w2, b2, alpha1, alpha2),
        gcn2_ref(dense_norm_adj(ei1, ew1, N), x1r, w1, b1, w2, b2, alpha1, alpha2),
        gcn2_ref(dense_norm_adj(ei2, ew2, N), x2r, w1, b1, w2, b2, alpha1, alpha2),
    )
    for got, want in zip((z, z1, z2), refs):
        assert got.shape == (N, H)
        assert bool(jnp.allclose(got, want, rtol=1e-1, atol=1e-1)), \
            float(jnp.max(jnp.abs(got - want)))

    print("KERNEL_OK")
</pallas_src>

<mosaic_0001>
module attributes {stable_mosaic.version = 11 : i64} {
  func.func @gcn2_views_kernel(%arg0: i32, %arg1: memref<3x128x128xbf16, #tpu.memory_space<vmem>>, %arg2: memref<256x128xbf16, #tpu.memory_space<vmem>>, %arg3: memref<128x128xbf16, #tpu.memory_space<vmem>>, %arg4: memref<128x128xbf16, #tpu.memory_space<vmem>>, %arg5: memref<1x128xf32, #tpu.memory_space<vmem>>, %arg6: memref<1x128xf32, #tpu.memory_space<vmem>>, %arg7: memref<1x128xf32, #tpu.memory_space<vmem>>, %arg8: memref<1x128xf32, #tpu.memory_space<vmem>>, %arg9: memref<384x128xf32, #tpu.memory_space<vmem>>) attributes {dimension_semantics = [#tpu.dimension_semantics<arbitrary>], iteration_bounds = array<i64: 1>, scalar_prefetch = 0 : i64, scratch_operands = 0 : i64, tpu.core_type = #tpu.core_type<tc>, window_params = [{pipeline_mode = #tpu.pipeline_mode<synchronous>, transform_indices = @transform_0, window_bounds = array<i64: 3, 128, 128>}, {pipeline_mode = #tpu.pipeline_mode<synchronous>, transform_indices = @transform_1, window_bounds = array<i64: 256, 128>}, {pipeline_mode = #tpu.pipeline_mode<synchronous>, transform_indices = @transform_2, window_bounds = array<i64: 128, 128>}, {pipeline_mode = #tpu.pipeline_mode<synchronous>, transform_indices = @transform_3, window_bounds = array<i64: 128, 128>}, {pipeline_mode = #tpu.pipeline_mode<synchronous>, transform_indices = @transform_4, window_bounds = array<i64: 1, 128>}, {pipeline_mode = #tpu.pipeline_mode<synchronous>, transform_indices = @transform_5, window_bounds = array<i64: 1, 128>}, {pipeline_mode = #tpu.pipeline_mode<synchronous>, transform_indices = @transform_6, window_bounds = array<i64: 1, 128>}, {pipeline_mode = #tpu.pipeline_mode<synchronous>, transform_indices = @transform_7, window_bounds = array<i64: 1, 128>}, {pipeline_mode = #tpu.pipeline_mode<synchronous>, transform_indices = @transform_8, window_bounds = array<i64: 384, 128>}]} {
    %c0 = arith.constant 0 : index
    %c0_0 = arith.constant 0 : index
    %0 = vector.load %arg2[%c0, %c0_0] : memref<256x128xbf16, #tpu.memory_space<vmem>>, vector<256x128xbf16>
    %c0_1 = arith.constant 0 : index
    %c0_2 = arith.constant 0 : index
    %1 = vector.load %arg3[%c0_1, %c0_2] : memref<128x128xbf16, #tpu.memory_space<vmem>>, vector<128x128xbf16>
    %cst = arith.constant dense<0.000000e+00> : vector<256x128xf32>
    %2 = tpu.matmul %0, %1, %cst {dimension_numbers = #tpu.dot_dimension_numbers<[1], [0], [0], [1], [0, 0, 1, 1], [], []>} : vector<256x128xbf16>, vector<128x128xbf16>, vector<256x128xf32> -> vector<256x128xf32>
    %3 = arith.truncf %2 : vector<256x128xf32> to vector<256x128xbf16>
    %c0_3 = arith.constant 0 : index
    %c0_4 = arith.constant 0 : index
    %4 = vector.load %arg7[%c0_3, %c0_4] : memref<1x128xf32, #tpu.memory_space<vmem>>, vector<1x128xf32>
    %c0_5 = arith.constant 0 : index
    %c0_6 = arith.constant 0 : index
    %5 = vector.load %arg8[%c0_5, %c0_6] : memref<1x128xf32, #tpu.memory_space<vmem>>, vector<1x128xf32>
    %6 = vector.extract_strided_slice %3 {offsets = [0, 0], sizes = [128, 128], strides = [1, 1]} : vector<256x128xbf16> to vector<128x128xbf16>
    %c0_7 = arith.constant 0 : index
    %c0_8 = arith.constant 0 : index
    %c0_9 = arith.constant 0 : index
    %7 = vector.load %arg1[%c0_7, %c0_8, %c0_9] : memref<3x128x128xbf16, #tpu.memory_space<vmem>>, vector<1x128x128xbf16>
    %8 = vector.shape_cast %7 : vector<1x128x128xbf16> to vector<128x128xbf16>
    %cst_10 = arith.constant dense<0.000000e+00> : vector<128x128xf32>
    %9 = tpu.matmul %8, %6, %cst_10 {dimension_numbers = #tpu.dot_dimension_numbers<[1], [0], [0], [1], [0, 0, 1, 1], [], []>} : vector<128x128xbf16>, vector<128x128xbf16>, vector<128x128xf32> -> vector<128x128xf32>
    %c0_11 = arith.constant 0 : index
    %c0_12 = arith.constant 0 : index
    %10 = vector.load %arg5[%c0_11, %c0_12] : memref<1x128xf32, #tpu.memory_space<vmem>>, vector<1x128xf32>
    %11 = vector.broadcast %10 : vector<1x128xf32> to vector<128x128xf32>
    %12 = arith.addf %9, %11 : vector<128x128xf32>
    %cst_13 = arith.constant 0.000000e+00 : f32
    %13 = vector.broadcast %cst_13 : f32 to vector<128x128xf32>
    %14 = arith.cmpf ogt, %12, %13 : vector<128x128xf32>
    %15 = vector.broadcast %4 : vector<1x128xf32> to vector<128x128xf32>
    %16 = arith.mulf %15, %12 : vector<128x128xf32>
    %17 = arith.select %14, %12, %16 : vector<128x128xi1>, vector<128x128xf32>
    %18 = arith.truncf %17 : vector<128x128xf32> to vector<128x128xbf16>
    %19 = vector.extract_strided_slice %3 {offsets = [128, 0], sizes = [128, 128], strides = [1, 1]} : vector<256x128xbf16> to vector<128x128xbf16>
    %c1 = arith.constant 1 : index
    %c0_14 = arith.constant 0 : index
    %c0_15 = arith.constant 0 : index
    %20 = vector.load %arg1[%c1, %c0_14, %c0_15] : memref<3x128x128xbf16, #tpu.memory_space<vmem>>, vector<1x128x128xbf16>
    %21 = vector.shape_cast %20 : vector<1x128x128xbf16> to vector<128x128xbf16>
    %cst_16 = arith.constant dense<0.000000e+00> : vector<128x128xf32>
    %22 = tpu.matmul %21, %19, %cst_16 {dimension_numbers = #tpu.dot_dimension_numbers<[1], [0], [0], [1], [0, 0, 1, 1], [], []>} : vector<128x128xbf16>, vector<128x128xbf16>, vector<128x128xf32> -> vector<128x128xf32>
    %c0_17 = arith.constant 0 : index
    %c0_18 = arith.constant 0 : index
    %23 = vector.load %arg5[%c0_17, %c0_18] : memref<1x128xf32, #tpu.memory_space<vmem>>, vector<1x128xf32>
    %24 = vector.broadcast %23 : vector<1x128xf32> to vector<128x128xf32>
    %25 = arith.addf %22, %24 : vector<128x128xf32>
    %cst_19 = arith.constant 0.000000e+00 : f32
    %26 = vector.broadcast %cst_19 : f32 to vector<128x128xf32>
    %27 = arith.cmpf ogt, %25, %26 : vector<128x128xf32>
    %28 = vector.broadcast %4 : vector<1x128xf32> to vector<128x128xf32>
    %29 = arith.mulf %28, %25 : vector<128x128xf32>
    %30 = arith.select %27, %25, %29 : vector<128x128xi1>, vector<128x128xf32>
    %31 = arith.truncf %30 : vector<128x128xf32> to vector<128x128xbf16>
    %32 = vector.extract_strided_slice %3 {offsets = [0, 0], sizes = [128, 128], strides = [1, 1]} : vector<256x128xbf16> to vector<128x128xbf16>
    %c2 = arith.constant 2 : index
    %c0_20 = arith.constant 0 : index
    %c0_21 = arith.constant 0 : index
    %33 = vector.load %arg1[%c2, %c0_20, %c0_21] : memref<3x128x128xbf16, #tpu.memory_space<vmem>>, vector<1x128x128xbf16>
    %34 = vector.shape_cast %33 : vector<1x128x128xbf16> to vector<128x128xbf16>
    %cst_22 = arith.constant dense<0.000000e+00> : vector<128x128xf32>
    %35 = tpu.matmul %34, %32, %cst_22 {dimension_numbers = #tpu.dot_dimension_numbers<[1], [0], [0], [1], [0, 0, 1, 1], [], []>} : vector<128x128xbf16>, vector<128x128xbf16>, vector<128x128xf32> -> vector<128x128xf32>
    %c0_23 = arith.constant 0 : index
    %c0_24 = arith.constant 0 : index
    %36 = vector.load %arg5[%c0_23, %c0_24] : memref<1x128xf32, #tpu.memory_space<vmem>>, vector<1x128xf32>
    %37 = vector.broadcast %36 : vector<1x128xf32> to vector<128x128xf32>
    %38 = arith.addf %35, %37 : vector<128x128xf32>
    %cst_25 = arith.constant 0.000000e+00 : f32
    %39 = vector.broadcast %cst_25 : f32 to vector<128x128xf32>
    %40 = arith.cmpf ogt, %38, %39 : vector<128x128xf32>
    %41 = vector.broadcast %4 : vector<1x128xf32> to vector<128x128xf32>
    %42 = arith.mulf %41, %38 : vector<128x128xf32>
    %43 = arith.select %40, %38, %42 : vector<128x128xi1>, vector<128x128xf32>
    %44 = arith.truncf %43 : vector<128x128xf32> to vector<128x128xbf16>
    %c0_26 = arith.constant 0 : index
    %c0_27 = arith.constant 0 : index
    %c0_28 = arith.constant 0 : index
    %45 = vector.load %arg1[%c0_26, %c0_27, %c0_28] : memref<3x128x128xbf16, #tpu.memory_space<vmem>>, vector<1x128x128xbf16>
    %46 = vector.shape_cast %45 : vector<1x128x128xbf16> to vector<128x128xbf16>
    %cst_29 = arith.constant dense<0.000000e+00> : vector<128x128xf32>
    %47 = tpu.matmul %46, %18, %cst_29 {dimension_numbers = #tpu.dot_dimension_numbers<[1], [0], [0], [1], [0, 0, 1, 1], [], []>} : vector<128x128xbf16>, vector<128x128xbf16>, vector<128x128xf32> -> vector<128x128xf32>
    %48 = arith.truncf %47 : vector<128x128xf32> to vector<128x128xbf16>
    %c1_30 = arith.constant 1 : index
    %c0_31 = arith.constant 0 : index
    %c0_32 = arith.constant 0 : index
    %49 = vector.load %arg1[%c1_30, %c0_31, %c0_32] : memref<3x128x128xbf16, #tpu.memory_space<vmem>>, vector<1x128x128xbf16>
    %50 = vector.shape_cast %49 : vector<1x128x128xbf16> to vector<128x128xbf16>
    %cst_33 = arith.constant dense<0.000000e+00> : vector<128x128xf32>
    %51 = tpu.matmul %50, %31, %cst_33 {dimension_numbers = #tpu.dot_dimension_numbers<[1], [0], [0], [1], [0, 0, 1, 1], [], []>} : vector<128x128xbf16>, vector<128x128xbf16>, vector<128x128xf32> -> vector<128x128xf32>
    %52 = arith.truncf %51 : vector<128x128xf32> to vector<128x128xbf16>
    %c2_34 = arith.constant 2 : index
    %c0_35 = arith.constant 0 : index
    %c0_36 = arith.constant 0 : index
    %53 = vector.load %arg1[%c2_34, %c0_35, %c0_36] : memref<3x128x128xbf16, #tpu.memory_space<vmem>>, vector<1x128x128xbf16>
    %54 = vector.shape_cast %53 : vector<1x128x128xbf16> to vector<128x128xbf16>
    %cst_37 = arith.constant dense<0.000000e+00> : vector<128x128xf32>
    %55 = tpu.matmul %54, %44, %cst_37 {dimension_numbers = #tpu.dot_dimension_numbers<[1], [0], [0], [1], [0, 0, 1, 1], [], []>} : vector<128x128xbf16>, vector<128x128xbf16>, vector<128x128xf32> -> vector<128x128xf32>
    %56 = arith.truncf %55 : vector<128x128xf32> to vector<128x128xbf16>
    %57 = tpu.concatenate %48, %52, %56 in 0 : vector<128x128xbf16>, vector<128x128xbf16>, vector<128x128xbf16> -> vector<384x128xbf16>
    %c0_38 = arith.constant 0 : index
    %c0_39 = arith.constant 0 : index
    %58 = vector.load %arg4[%c0_38, %c0_39] : memref<128x128xbf16, #tpu.memory_space<vmem>>, vector<128x128xbf16>
    %cst_40 = arith.constant dense<0.000000e+00> : vector<384x128xf32>
    %59 = tpu.matmul %57, %58, %cst_40 {dimension_numbers = #tpu.dot_dimension_numbers<[1], [0], [0], [1], [0, 0, 1, 1], [], []>} : vector<384x128xbf16>, vector<128x128xbf16>, vector<384x128xf32> -> vector<384x128xf32>
    %c0_41 = arith.constant 0 : index
    %c0_42 = arith.constant 0 : index
    %60 = vector.load %arg6[%c0_41, %c0_42] : memref<1x128xf32, #tpu.memory_space<vmem>>, vector<1x128xf32>
    %61 = vector.broadcast %60 : vector<1x128xf32> to vector<384x128xf32>
    %62 = arith.addf %59, %61 : vector<384x128xf32>
    %cst_43 = arith.constant 0.000000e+00 : f32
    %63 = vector.broadcast %cst_43 : f32 to vector<384x128xf32>
    %64 = arith.cmpf ogt, %62, %63 : vector<384x128xf32>
    %65 = vector.broadcast %5 : vector<1x128xf32> to vector<384x128xf32>
    %66 = arith.mulf %65, %62 : vector<384x128xf32>
    %67 = arith.select %64, %62, %66 : vector<384x128xi1>, vector<384x128xf32>
    %c0_44 = arith.constant 0 : index
    %c0_45 = arith.constant 0 : index
    %68 = vector.load %arg9[%c0_44, %c0_45] : memref<384x128xf32, #tpu.memory_space<vmem>>, vector<384x128xf32>
    tpu.vector_store %arg9[%c0_44, %c0_45], %67 {strides = array<i32>} : memref<384x128xf32, #tpu.memory_space<vmem>>, vector<384x128xf32>,
    return
  }
  func.func @transform_0(%arg0: i32) -> (i32, i32, i32) {
    %c0_i32 = arith.constant 0 : i32
    %c0_i32_0 = arith.constant 0 : i32
    %c0_i32_1 = arith.constant 0 : i32
    %c0_i32_2 = arith.constant 0 : i32
    return %c0_i32, %c0_i32_0, %c0_i32_1 : i32, i32, i32
  }
  func.func @transform_1(%arg0: i32) -> (i32, i32) {
    %c0_i32 = arith.constant 0 : i32
    %c0_i32_0 = arith.constant 0 : i32
    %c0_i32_1 = arith.constant 0 : i32
    return %c0_i32, %c0_i32_0 : i32, i32
  }
  func.func @transform_2(%arg0: i32) -> (i32, i32) {
    %c0_i32 = arith.constant 0 : i32
    %c0_i32_0 = arith.constant 0 : i32
    %c0_i32_1 = arith.constant 0 : i32
    return %c0_i32, %c0_i32_0 : i32, i32
  }
  func.func @transform_3(%arg0: i32) -> (i32, i32) {
    %c0_i32 = arith.constant 0 : i32
    %c0_i32_0 = arith.constant 0 : i32
    %c0_i32_1 = arith.constant 0 : i32
    return %c0_i32, %c0_i32_0 : i32, i32
  }
  func.func @transform_4(%arg0: i32) -> (i32, i32) {
    %c0_i32 = arith.constant 0 : i32
    %c0_i32_0 = arith.constant 0 : i32
    %c0_i32_1 = arith.constant 0 : i32
    return %c0_i32, %c0_i32_0 : i32, i32
  }
  func.func @transform_5(%arg0: i32) -> (i32, i32) {
    %c0_i32 = arith.constant 0 : i32
    %c0_i32_0 = arith.constant 0 : i32
    %c0_i32_1 = arith.constant 0 : i32
    return %c0_i32, %c0_i32_0 : i32, i32
  }
  func.func @transform_6(%arg0: i32) -> (i32, i32) {
    %c0_i32 = arith.constant 0 : i32
    %c0_i32_0 = arith.constant 0 : i32
    %c0_i32_1 = arith.constant 0 : i32
    return %c0_i32, %c0_i32_0 : i32, i32
  }
  func.func @transform_7(%arg0: i32) -> (i32, i32) {
    %c0_i32 = arith.constant 0 : i32
    %c0_i32_0 = arith.constant 0 : i32
    %c0_i32_1 = arith.constant 0 : i32
    return %c0_i32, %c0_i32_0 : i32, i32
  }
  func.func @transform_8(%arg0: i32) -> (i32, i32) {
    %c0_i32 = arith.constant 0 : i32
    %c0_i32_0 = arith.constant 0 : i32
    %c0_i32_1 = arith.constant 0 : i32
    return %c0_i32, %c0_i32_0 : i32, i32
  }
}

</mosaic_0001>

<bundles_post_ra>
// kernel: tpu_custom_call.1
= control target key start
LH: loop header
LB: loop body
LE: loop exit
PB: predicated region body
PF: predicated region fallthrough
CT: control target
= control target key end

     0   :  { %13 = vsyncpa [#allocation3], 0  ;;  %s3220_s0 = inlined_call_operand.hbm [shape: bf16[3,128,128], index: 0, kind: input, shape index: {}]   ;;  %s3221_s1 = inlined_call_operand.hbm [shape: bf16[256,128], index: 1, kind: input, shape index: {}]   ;;  %s3222_s2 = inlined_call_operand.hbm [shape: bf16[128,128], index: 2, kind: input, shape index: {}]   ;;  %s3223_s3 = inlined_call_operand.hbm [shape: bf16[128,128], index: 3, kind: input, shape index: {}]   ;;  %s3224_s4 = inlined_call_operand.vmem [shape: f32[1,128], index: 4, kind: input, shape index: {}]   ;;  %s3225_s5 = inlined_call_operand.vmem [shape: f32[1,128], index: 5, kind: input, shape index: {}]   ;;  %s3226_s6 = inlined_call_operand.vmem [shape: f32[1,128], index: 6, kind: input, shape index: {}]   ;;  %s3227_s7 = inlined_call_operand.vmem [shape: f32[1,128], index: 7, kind: input, shape index: {}]   ;;  %s3228_s8 = inlined_call_operand.hbm [shape: f32[384,128], index: 8, kind: output, shape index: {}]  }
   0x1   :  { %14 = vsyncpa [#allocation6], 0 }
   0x2   :  { %15 = vsyncpa [#allocation9], 0 }
   0x3   :  { %16 = vsyncpa [#allocation4], 0  ;;  %s2666_s27 = smov [#allocation5]   ;;  %s2667_s29 = smov [#allocation2]  }
   0x4   :  { %s34_s28 = sshll.u32 %s2666_s27, 4  ;;  %s22_s30 = sshll.u32 %s2667_s29, 4  ;;  %s35_s28 = int_to_ptr.vmem [resolvable:$true] %s34_s28  ;;  %s2720_s30 = int_to_ptr.vmem [resolvable:$true] %s22_s30 }
   0x5   :  { %s2548_s11 = scalar_lea.hbm %s3221_s1, 2048 }
   0x6   :  { %p2549_p0 = scmp.ne.s32.totalorder %s3221_s1, %s2548_s11  ;;  %p2552_p1 = scmp.lt.u32.totalorder %s2548_s11, %s3221_s1 }
   0x8   :  { %p2554_p2 = pnand %p2552_p1, %p2549_p0 }
   0xa   :  { %2557 = shalt.err (!%p2554_p2)
}
   0xb   :  { %s2558_s16 = scalar_lea.vmem %s35_s28, 2048  ;;  %p2563_p4 = scmp.lt.s32.totalorder %s35_s28, %s35_s28 }
   0xc   :  { %p2559_p3 = scmp.ne.s32.totalorder %s35_s28, %s2558_s16  ;;  %p2564_p5 = scmp.lt.s32.totalorder %s2558_s16, %s2558_s16 }
   0xe   :  { %p2565_p6 = por %p2564_p5, %p2563_p4 }
  0x10   :  { %p2566_p7 = pnand %p2565_p6, %p2559_p3 }
  0x12   :  { %2569 = shalt.err (!%p2566_p7)
}
  0x13   :  { %s2668_s17 = smov 64   ;;  %s2669_s18 = smov 4  }
  0x14   :  { %40 = dma.hbm_to_vmem [thread:$0]  %s3221_s1, 2048, %s35_s28, [#allocation6], %s2668_s17, %s2668_s17, %s2669_s18  }
  0x15   :  { %s2570_s23 = scalar_lea.hbm %s3220_s0, 3072 }
  0x16   :  { %p2571_p8 = scmp.ne.s32.totalorder %s3220_s0, %s2570_s23  ;;  %p2574_p9 = scmp.lt.u32.totalorder %s2570_s23, %s3220_s0 }
  0x18   :  { %p2576_p10 = pnand %p2574_p9, %p2571_p8 }
  0x1a   :  { %2579 = shalt.err (!%p2576_p10)
}
  0x1b   :  { %s2580_s29 = scalar_lea.vmem %s2720_s30, 3072  ;;  %p2585_p12 = scmp.lt.s32.totalorder %s2720_s30, %s2720_s30 }
  0x1c   :  { %p2581_p11 = scmp.ne.s32.totalorder %s2720_s30, %s2580_s29  ;;  %p2586_p13 = scmp.lt.s32.totalorder %s2580_s29, %s2580_s29 }
  0x1e   :  { %p2587_p0 = por %p2586_p13, %p2585_p12 }
  0x20   :  { %p2588_p1 = pnand %p2587_p0, %p2581_p11 }
  0x22   :  { %2591 = shalt.err (!%p2588_p1)
}
  0x23   :  { %28 = dma.hbm_to_vmem [thread:$0]  %s3220_s0, 3072, %s2720_s30, [#allocation3], %s2668_s17, %s2668_s17, %s2669_s18  }
  0x24   :  { %s2670_s9 = smov [#allocation7]   ;;  %s2671_s11 = smov [#allocation8]  }
  0x25   :  { %s46_s10 = sshll.u32 %s2670_s9, 4  ;;  %s58_s12 = sshll.u32 %s2671_s11, 4  ;;  %s47_s10 = int_to_ptr.vmem [resolvable:$true] %s46_s10  ;;  %s2757_s12 = int_to_ptr.vmem [resolvable:$true] %s58_s12 }
  0x26   :  { %s2592_s15 = scalar_lea.hbm %s3222_s2, 1024 }
  0x27   :  { %p2593_p2 = scmp.ne.s32.totalorder %s3222_s2, %s2592_s15  ;;  %p2596_p3 = scmp.lt.u32.totalorder %s2592_s15, %s3222_s2 }
  0x29   :  { %p2598_p4 = pnand %p2596_p3, %p2593_p2 }
  0x2b   :  { %2601 = shalt.err (!%p2598_p4)
}
  0x2c   :  { %s2602_s0 = scalar_lea.vmem %s47_s10, 1024  ;;  %p2607_p6 = scmp.lt.s32.totalorder %s47_s10, %s47_s10 }
  0x2d   :  { %p2603_p5 = scmp.ne.s32.totalorder %s47_s10, %s2602_s0  ;;  %p2608_p7 = scmp.lt.s32.totalorder %s2602_s0, %s2602_s0 }
  0x2f   :  { %p2609_p8 = por %p2608_p7, %p2607_p6 }
  0x31   :  { %p2610_p9 = pnand %p2609_p8, %p2603_p5 }
  0x33   :  { %2613 = shalt.err (!%p2610_p9)
}
  0x34   :  { %52 = dma.hbm_to_vmem [thread:$0]  %s3222_s2, 1024, %s47_s10, [#allocation6], %s2668_s17, %s2668_s17, %s2669_s18  }
  0x35   :  { %s2614_s25 = scalar_lea.hbm %s3223_s3, 1024 }
  0x36   :  { %p2615_p10 = scmp.ne.s32.totalorder %s3223_s3, %s2614_s25  ;;  %p2618_p11 = scmp.lt.u32.totalorder %s2614_s25, %s3223_s3 }
  0x38   :  { %p2620_p12 = pnand %p2618_p11, %p2615_p10 }
  0x3a   :  { %2623 = shalt.err (!%p2620_p12)
}
  0x3b   :  { %s2624_s28 = scalar_lea.vmem %s2757_s12, 1024  ;;  %p2629_p0 = scmp.lt.s32.totalorder %s2757_s12, %s2757_s12 }
  0x3c   :  { %p2625_p13 = scmp.ne.s32.totalorder %s2757_s12, %s2624_s28  ;;  %p2630_p1 = scmp.lt.s32.totalorder %s2624_s28, %s2624_s28 }
  0x3e   :  { %p2631_p2 = por %p2630_p1, %p2629_p0 }
  0x40   :  { %p2632_p3 = pnand %p2631_p2, %p2625_p13 }
  0x42   :  { %2635 = shalt.err (!%p2632_p3)
}
  0x43   :  { %64 = dma.hbm_to_vmem [thread:$0]  %s3223_s3, 1024, %s2757_s12, [#allocation9], %s2668_s17, %s2668_s17, %s2669_s18  }
  0x44   :  { %2658 = dma.done.wait [#allocation3], 3072  }
  0x45   :  { %2659 = vsyncadd [#allocation3], 4294964224 }
  0x46   :  { %2660 = dma.done.wait [#allocation6], 3072  }
  0x47   :  { %2661 = vsyncadd [#allocation6], 4294964224 }
  0x48   :  { %2662 = dma.done.wait [#allocation9], 1024  }
  0x49   :  { %2663 = vsyncadd [#allocation9], 4294966272  ;;  %v2492_v0 = vld [vmem:[#allocation7] sm:$0xff]   ;;  %v2493_v1 = vld [vmem:[#allocation7 + $0x8] sm:$0xff]  }
  0x4a   :  { %2163 = vmatprep.subr.bf16.mxu0 %v2492_v0  ;;  %v2494_v2 = vld [vmem:[#allocation7 + $0x10] sm:$0xff]   ;;  %v2495_v3 = vld [vmem:[#allocation7 + $0x18] sm:$0xff]   ;;  %v2500_v4 = vld [vmem:[#allocation5] sm:$0xff]  }
  0x4b   :  { %2164 = vmatpush3.bf16.msra.mxu0 %v2492_v0  ;;  %2179 = vmatprep.mubr.bf16.mxu0 %v2500_v4  ;;  %v2496_v5 = vld [vmem:[#allocation7 + $0x20] sm:$0xff]   ;;  %v2497_v6 = vld [vmem:[#allocation7 + $0x28] sm:$0xff]   ;;  %v2498_v7 = vld [vmem:[#allocation7 + $0x30] sm:$0xff]  }
  0x4c   :  { %2165 = vmatprep.subr.bf16.mxu0 %v2493_v1  ;;  %v2499_v8 = vld [vmem:[#allocation7 + $0x38] sm:$0xff]   ;;  %v2501_v9 = vld [vmem:[#allocation5 + $0x8] sm:$0xff]   ;;  %v2502_v10 = vld [vmem:[#allocation5 + $0x10] sm:$0xff]  }
  0x4d   :  { %v2503_v11 = vld [vmem:[#allocation5 + $0x18] sm:$0xff]   ;;  %v2504_v12 = vld [vmem:[#allocation5 + $0x20] sm:$0xff]   ;;  %v2505_v13 = vld [vmem:[#allocation5 + $0x28] sm:$0xff]  }
  0x4e   :  { %v2506_v14 = vld [vmem:[#allocation5 + $0x30] sm:$0xff]   ;;  %v2507_v15 = vld [vmem:[#allocation5 + $0x38] sm:$0xff]   ;;  %v2508_v16 = vld [vmem:[#allocation5 + $0x40] sm:$0xff]  }
  0x4f   :  { %2166 = vmatpush3.bf16.msra.mxu0 %v2493_v1  ;;  %v2509_v17 = vld [vmem:[#allocation5 + $0x48] sm:$0xff]   ;;  %v2510_v18 = vld [vmem:[#allocation5 + $0x50] sm:$0xff]   ;;  %v2511_v19 = vld [vmem:[#allocation5 + $0x58] sm:$0xff]  }
  0x50   :  { %2167 = vmatprep.subr.bf16.mxu0 %v2494_v2  ;;  %v2512_v20 = vld [vmem:[#allocation5 + $0x60] sm:$0xff]   ;;  %v2513_v21 = vld [vmem:[#allocation5 + $0x68] sm:$0xff]   ;;  %v2514_v22 = vld [vmem:[#allocation5 + $0x70] sm:$0xff]  }
  0x51   :  { %v2515_v23 = vld [vmem:[#allocation5 + $0x78] sm:$0xff]   ;;  %v2794_v24 = vld [vmem:[#allocation2] sm:$0xff]   ;;  %v2800_v53 = vld [vmem:[#allocation2 + $0x8] sm:$0xff]  }
  0x52   :  { %2227 = vmatprep.mubr.bf16.mxu1 %v2794_v24  ;;  %v2797_v25 = vld [vmem:[#allocation2 + $0x80] sm:$0xff]   ;;  %v2802_v56 = vld [vmem:[#allocation2 + $0x10] sm:$0xff]   ;;  %v2804_v58 = vld [vmem:[#allocation2 + $0x88] sm:$0xff]  }
  0x53   :  { %2168 = vmatpush3.bf16.msra.mxu0 %v2494_v2  ;;  %v2806_v59 = vld [vmem:[#allocation2 + $0x90] sm:$0xff]   ;;  %v2812_v63 = vld [vmem:[#allocation2 + $0x18] sm:$0xff]   ;;  %v2814_v2 = vld [vmem:[#allocation2 + $0x20] sm:$0xff]  }
  0x54   :  { %2169 = vmatprep.subr.bf16.mxu0 %v2495_v3  ;;  %v2816_v4 = vld [vmem:[#allocation2 + $0x98] sm:$0xff]  }
  0x57   :  { %2170 = vmatpush3.bf16.msra.mxu0 %v2495_v3 }
  0x58   :  { %2171 = vmatprep.subr.bf16.mxu0 %v2496_v5 }
  0x5b   :  { %2172 = vmatpush3.bf16.msra.mxu0 %v2496_v5  ;;  %v2818_v5 = vld [vmem:[#allocation2 + $0xa0] sm:$0xff]  }
  0x5c   :  { %2173 = vmatprep.subr.bf16.mxu0 %v2497_v6 }
  0x5f   :  { %2174 = vmatpush3.bf16.msra.mxu0 %v2497_v6 }
  0x60   :  { %2175 = vmatprep.subr.bf16.mxu0 %v2498_v7 }
  0x63   :  { %2176 = vmatpush3.bf16.msra.mxu0 %v2498_v7 }
  0x64   :  { %2177 = vmatprep.subr.bf16.mxu0 %v2499_v8 }
  0x67   :  { %2178 = vmatpush3.bf16.msra.mxu0 %v2499_v8 }
  0x6a   :  { %2180 = vmatmul.mubr.bf16.vlgmr.msra.gmra.mrb[0].mxu0 %v2501_v9  ;;  %v2824_v9 = vld [vmem:[#allocation2 + $0x28] sm:$0xff]  }
  0x6b   :  { %2183 = vmatprep.mubr.bf16.mxu0 %v2502_v10 }
  0x72   :  { %2184 = vmatmul.mubr.bf16.gmra.mrb[4].mxu0 %v2503_v11 }
  0x73   :  { %2187 = vmatprep.mubr.bf16.mxu0 %v2504_v12  ;;  %v2826_v12 = vld [vmem:[#allocation2 + $0x30] sm:$0xff]  }
  0x7a   :  { %2188 = vmatmul.mubr.bf16.gmra.mrb[8].mxu0 %v2505_v13 }
  0x7b   :  { %2191 = vmatprep.mubr.bf16.mxu0 %v2506_v14  ;;  %v2828_v14 = vld [vmem:[#allocation2 + $0xa8] sm:$0xff]  }
  0x82   :  { %2192 = vmatmul.mubr.bf16.gmra.mrb[12].mxu0 %v2507_v15  ;;  %v2830_v15 = vld [vmem:[#allocation2 + $0xb0] sm:$0xff]  }
  0x83   :  { %2195 = vmatprep.mubr.bf16.mxu0 %v2508_v16 }
  0x8a   :  { %2196 = vmatmul.mubr.bf16.gmra.mrb[16].mxu0 %v2509_v17 }
  0x8b   :  { %2199 = vmatprep.mubr.bf16.mxu0 %v2510_v18 }
  0x92   :  { %2200 = vmatmul.mubr.bf16.gmra.mrb[20].mxu0 %v2511_v19  ;;  %v2836_v19 = vld [vmem:[#allocation2 + $0x38] sm:$0xff]  }
  0x93   :  { %2203 = vmatprep.mubr.bf16.mxu0 %v2512_v20 }
  0x9a   :  { %2204 = vmatmul.mubr.bf16.gmra.mrb[24].mxu0 %v2513_v21 }
  0x9b   :  { %2207 = vmatprep.mubr.bf16.mxu0 %v2514_v22  ;;  %v2524_v22 = vld [vmem:[#allocation2 + $0x40] sm:$0xff]  }
  0xa2   :  { %2208 = vmatmul.mubr.bf16.gmra.mrb[28].mxu0 %v2515_v23 }
  0xa3   :  { %2291 = vmatprep.mubr.bf16.mxu0 %v2797_v25 }
 0x13d   :  { %v2181_v26 = vpop.f32.mrb[0].mxu0 }
 0x13e   :  { %v312_v27 = vpop.f32.mrb[1].mxu0 }
 0x13f   :  { %v2182_v28 = vpop.f32.mrb[2].mxu0 }
 0x140   :  { %v440_v29 = vpack.c.bf16 %v2182_v28, %v2181_v26  ;;  %v315_v30 = vpop.f32.mrb[3].mxu0  ;;  %v2838_v26 = vld [vmem:[#allocation2 + $0xb8] sm:$0xff]   ;;  %v2844_v28 = vld [vmem:[#allocation2 + $0x50] sm:$0xff]  }
 0x141   :  { %v439_v31 = vpack.c.bf16 %v315_v30, %v312_v27  ;;  %v2842_v27 = vld [vmem:[#allocation2 + $0x48] sm:$0xff]   ;;  %v2850_v30 = vld [vmem:[#allocation2 + $0x60] sm:$0xff]  }
 0x143   :  { %2211 = vmatprep.subr.bf16.mxu1 %v439_v31  ;;  %2275 = vmatprep.subr.bf16.mxu0 %v439_v31 }
 0x144   :  { %2212 = vmatpush3.bf16.msra.mxu1 %v439_v31  ;;  %2276 = vmatpush3.bf16.msra.mxu0 %v439_v31  ;;  %v2854_v31 = vld [vmem:[#allocation2 + $0x68] sm:$0xff]  }
 0x145   :  { %v2185_v32 = vpop.f32.mrb[4].mxu0  ;;  %2213 = vmatprep.subr.bf16.mxu1 %v440_v29  ;;  %2277 = vmatprep.subr.bf16.mxu0 %v440_v29 }
 0x146   :  { %v328_v33 = vpop.f32.mrb[5].mxu0 }
 0x147   :  { %v2186_v34 = vpop.f32.mrb[6].mxu0 }
 0x148   :  { %v442_v35 = vpack.c.bf16 %v2186_v34, %v2185_v32  ;;  %v331_v36 = vpop.f32.mrb[7].mxu0  ;;  %2214 = vmatpush3.bf16.msra.mxu1 %v440_v29  ;;  %2278 = vmatpush3.bf16.msra.mxu0 %v440_v29  ;;  %v2848_v29 = vld [vmem:[#allocation2 + $0x58] sm:$0xff]   ;;  %v2856_v32 = vld [vmem:[#allocation2 + $0x70] sm:$0xff]   ;;  %v2867_v34 = vld [vmem:[%s3224_s4] ss:$0 sm:$0xff] }
 0x149   :  { %v441_v37 = vpack.c.bf16 %v331_v36, %v328_v33  ;;  %v2860_v33 = vld [vmem:[#allocation2 + $0x78] sm:$0xff]  }
 0x14b   :  { %2215 = vmatprep.subr.bf16.mxu1 %v441_v37  ;;  %2279 = vmatprep.subr.bf16.mxu0 %v441_v37 }
 0x14c   :  { %2216 = vmatpush3.bf16.msra.mxu1 %v441_v37  ;;  %2280 = vmatpush3.bf16.msra.mxu0 %v441_v37 }
 0x14d   :  { %v2189_v38 = vpop.f32.mrb[8].mxu0  ;;  %2217 = vmatprep.subr.bf16.mxu1 %v442_v35  ;;  %2281 = vmatprep.subr.bf16.mxu0 %v442_v35 }
 0x14e   :  { %v344_v39 = vpop.f32.mrb[9].mxu0 }
 0x14f   :  { %v2190_v40 = vpop.f32.mrb[10].mxu0 }
 0x150   :  { %v444_v41 = vpack.c.bf16 %v2190_v40, %v2189_v38  ;;  %v347_v42 = vpop.f32.mrb[11].mxu0  ;;  %2218 = vmatpush3.bf16.msra.mxu1 %v442_v35  ;;  %2282 = vmatpush3.bf16.msra.mxu0 %v442_v35  ;;  %v2872_v35 = vld [vmem:[%s3226_s6] ss:$0 sm:$0xff] }
 0x151   :  { %v443_v43 = vpack.c.bf16 %v347_v42, %v344_v39 }
 0x153   :  { %2219 = vmatprep.subr.bf16.mxu1 %v443_v43  ;;  %2283 = vmatprep.subr.bf16.mxu0 %v443_v43 }
 0x154   :  { %2220 = vmatpush3.bf16.msra.mxu1 %v443_v43  ;;  %2284 = vmatpush3.bf16.msra.mxu0 %v443_v43 }
 0x155   :  { %v2193_v44 = vpop.f32.mrb[12].mxu0  ;;  %2221 = vmatprep.subr.bf16.mxu1 %v444_v41  ;;  %2285 = vmatprep.subr.bf16.mxu0 %v444_v41 }
 0x156   :  { %v360_v45 = vpop.f32.mrb[13].mxu0 }
 0x157   :  { %v2194_v46 = vpop.f32.mrb[14].mxu0 }
 0x158   :  { %v446_v47 = vpack.c.bf16 %v2194_v46, %v2193_v44  ;;  %v363_v48 = vpop.f32.mrb[15].mxu0  ;;  %2222 = vmatpush3.bf16.msra.mxu1 %v444_v41  ;;  %2286 = vmatpush3.bf16.msra.mxu0 %v444_v41 }
 0x159   :  { %v445_v49 = vpack.c.bf16 %v363_v48, %v360_v45 }
 0x15b   :  { %2223 = vmatprep.subr.bf16.mxu1 %v445_v49  ;;  %2287 = vmatprep.subr.bf16.mxu0 %v445_v49 }
 0x15c   :  { %2224 = vmatpush3.bf16.msra.mxu1 %v445_v49  ;;  %2288 = vmatpush3.bf16.msra.mxu0 %v445_v49 }
 0x15d   :  { %v2197_v50 = vpop.f32.mrb[16].mxu0  ;;  %2225 = vmatprep.subr.bf16.mxu1 %v446_v47  ;;  %2289 = vmatprep.subr.bf16.mxu0 %v446_v47 }
 0x15e   :  { %v376_v51 = vpop.f32.mrb[17].mxu0 }
 0x15f   :  { %v2198_v52 = vpop.f32.mrb[18].mxu0 }
 0x160   :  { %v448_v54 = vpack.c.bf16 %v2198_v52, %v2197_v50  ;;  %v379_v55 = vpop.f32.mrb[19].mxu0  ;;  %2226 = vmatpush3.bf16.msra.mxu1 %v446_v47  ;;  %2290 = vmatpush3.bf16.msra.mxu0 %v446_v47 }
 0x161   :  { %v447_v57 = vpack.c.bf16 %v379_v55, %v376_v51 }
 0x163   :  { %2228 = vmatmul.mubr.bf16.vlgmr.msra.gmra.mrb[0].mxu1 %v2800_v53  ;;  %2243 = vmatprep.subr.bf16.mxu1 %v447_v57 }
 0x164   :  { %2244 = vmatpush3.bf16.msra.mxu1 %v447_v57  ;;  %2231 = vmatprep.mubr.bf16.mxu1 %v2802_v56 }
 0x165   :  { %v2201_v60 = vpop.f32.mrb[20].mxu0  ;;  %2245 = vmatprep.subr.bf16.mxu1 %v448_v54  ;;  %2292 = vmatmul.mubr.bf16.vlgmr.msra.gmra.mrb[32].mxu0 %v2804_v58 }
 0x166   :  { %v392_v61 = vpop.f32.mrb[21].mxu0  ;;  %2295 = vmatprep.mubr.bf16.mxu0 %v2806_v59 }
 0x167   :  { %v2202_v62 = vpop.f32.mrb[22].mxu0 }
 0x168   :  { %v450_v0 = vpack.c.bf16 %v2202_v62, %v2201_v60  ;;  %v395_v1 = vpop.f32.mrb[23].mxu0  ;;  %2246 = vmatpush3.bf16.msra.mxu1 %v448_v54 }
 0x169   :  { %v449_v3 = vpack.c.bf16 %v395_v1, %v392_v61 }
 0x16b   :  { %2232 = vmatmul.mubr.bf16.gmra.mrb[4].mxu1 %v2812_v63  ;;  %2247 = vmatprep.subr.bf16.mxu1 %v449_v3 }
 0x16c   :  { %2248 = vmatpush3.bf16.msra.mxu1 %v449_v3  ;;  %2235 = vmatprep.mubr.bf16.mxu1 %v2814_v2 }
 0x16d   :  { %v2205_v6 = vpop.f32.mrb[24].mxu0  ;;  %2249 = vmatprep.subr.bf16.mxu1 %v450_v0  ;;  %2296 = vmatmul.mubr.bf16.gmra.mrb[36].mxu0 %v2816_v4 }
 0x16e   :  { %v408_v7 = vpop.f32.mrb[25].mxu0  ;;  %2299 = vmatprep.mubr.bf16.mxu0 %v2818_v5 }
 0x16f   :  { %v2206_v8 = vpop.f32.mrb[26].mxu0 }
 0x170   :  { %v452_v10 = vpack.c.bf16 %v2206_v8, %v2205_v6  ;;  %v411_v11 = vpop.f32.mrb[27].mxu0  ;;  %2250 = vmatpush3.bf16.msra.mxu1 %v450_v0 }
 0x171   :  { %v451_v13 = vpack.c.bf16 %v411_v11, %v408_v7 }
 0x173   :  { %2236 = vmatmul.mubr.bf16.gmra.mrb[8].mxu1 %v2824_v9  ;;  %2251 = vmatprep.subr.bf16.mxu1 %v451_v13 }
 0x174   :  { %2252 = vmatpush3.bf16.msra.mxu1 %v451_v13  ;;  %2239 = vmatprep.mubr.bf16.mxu1 %v2826_v12 }
 0x175   :  { %v2209_v16 = vpop.f32.mrb[28].mxu0  ;;  %2253 = vmatprep.subr.bf16.mxu1 %v452_v10  ;;  %2300 = vmatmul.mubr.bf16.gmra.mrb[40].mxu0 %v2828_v14 }
 0x176   :  { %v424_v17 = vpop.f32.mrb[29].mxu0  ;;  %2303 = vmatprep.mubr.bf16.mxu0 %v2830_v15 }
 0x177   :  { %v2210_v18 = vpop.f32.mrb[30].mxu0 }
 0x178   :  { %v454_v20 = vpack.c.bf16 %v2210_v18, %v2209_v16  ;;  %v427_v21 = vpop.f32.mrb[31].mxu0  ;;  %2254 = vmatpush3.bf16.msra.mxu1 %v452_v10 }
 0x179   :  { %v453_v23 = vpack.c.bf16 %v427_v21, %v424_v17 }
 0x17b   :  { %2240 = vmatmul.mubr.bf16.gmra.mrb[12].mxu1 %v2836_v19  ;;  %2255 = vmatprep.subr.bf16.mxu1 %v453_v23 }
 0x17c   :  { %2256 = vmatpush3.bf16.msra.mxu1 %v453_v23  ;;  %2259 = vmatprep.mubr.bf16.mxu1 %v2524_v22 }
 0x17d   :  { %2257 = vmatprep.subr.bf16.mxu1 %v454_v20  ;;  %2304 = vmatmul.mubr.bf16.gmra.mrb[44].mxu0 %v2838_v26 }
 0x17e   :  { %2355 = vmatprep.mubr.bf16.mxu0 %v2524_v22 }
 0x180   :  { %2258 = vmatpush3.bf16.msra.mxu1 %v454_v20 }
 0x183   :  { %2260 = vmatmul.mubr.bf16.vlgmr.msra.gmra.mrb[16].mxu1 %v2842_v27 }
 0x184   :  { %2263 = vmatprep.mubr.bf16.mxu1 %v2844_v28 }
 0x18b   :  { %2264 = vmatmul.mubr.bf16.gmra.mrb[20].mxu1 %v2848_v29 }
 0x18c   :  { %2267 = vmatprep.mubr.bf16.mxu1 %v2850_v30 }
 0x193   :  { %2268 = vmatmul.mubr.bf16.gmra.mrb[24].mxu1 %v2854_v31 }
 0x194   :  { %2271 = vmatprep.mubr.bf16.mxu1 %v2856_v32 }
 0x19b   :  { %2272 = vmatmul.mubr.bf16.gmra.mrb[28].mxu1 %v2860_v33 }
 0x19c   :  { %2323 = vmatprep.mubr.bf16.mxu1 %v2794_v24 }
 0x236   :  { %v2229_v36 = vpop.f32.mrb[0].mxu1 }
 0x237   :  { %v571_v37 = vadd.f32 %v2229_v36, %v2867_v34  ;;  %v562_v38 = vpop.f32.mrb[1].mxu1 }
 0x238   :  { %v563_v39 = vadd.f32 %v2867_v34, %v562_v38  ;;  %v2230_v40 = vpop.f32.mrb[2].mxu1  ;;  %v2293_v41 = vpop.f32.mrb[32].mxu0 }
 0x239   :  { %v649_v24 = vmul.f32 %v2872_v35, %v571_v37  ;;  %v574_v42 = vadd.f32 %v2230_v40, %v2867_v34  ;;  %v565_v43 = vpop.f32.mrb[3].mxu1  ;;  %v1013_v44 = vadd.f32 %v2293_v41, %v2867_v34  ;;  %v1004_v45 = vpop.f32.mrb[33].mxu0  ;;  %vm627_vm0 = vcmp.gt.f32.partialorder %v571_v37, 0.0 }
 0x23a   :  { %v647_v46 = vmul.f32 %v2872_v35, %v563_v39  ;;  %v566_v47 = vadd.f32 %v2867_v34, %v565_v43  ;;  %v2294_v48 = vpop.f32.mrb[34].mxu0  ;;  %vm625_vm1 = vcmp.gt.f32.partialorder %v563_v39, 0.0  ;;  %v1005_v50 = vadd.f32 %v2867_v34, %v1004_v45 }
 0x23b   :  { %vm628_vm2 = vcmp.gt.f32.partialorder %v574_v42, 0.0  ;;  %v650_v49 = vmul.f32 %v2872_v35, %v574_v42  ;;  %v1007_v51 = vpop.f32.mrb[35].mxu0  ;;  %v1085_v54 = vmul.f32 %v2872_v35, %v1013_v44  ;;  %v665_v55 = vsel %vm627_vm0, %v571_v37, %v649_v24 }
 0x23c   :  { %vm626_vm3 = vcmp.gt.f32.partialorder %v566_v47, 0.0  ;;  %v648_v52 = vmul.f32 %v2872_v35, %v566_v47  ;;  %vm1069_vm4 = vcmp.gt.f32.partialorder %v1013_v44, 0.0  ;;  %v663_v61 = vsel %vm625_vm1, %v563_v39, %v647_v46 }
 0x23d   :  { %v666_v57 = vsel %vm628_vm2, %v574_v42, %v650_v49  ;;  %v1008_v1 = vadd.f32 %v2867_v34, %v1007_v51  ;;  %vm1067_vm5 = vcmp.gt.f32.partialorder %v1005_v50, 0.0  ;;  %v1083_v11 = vmul.f32 %v2872_v35, %v1005_v50 }
 0x23e   :  { %v2233_v60 = vpop.f32.mrb[4].mxu1  ;;  %v664_v62 = vsel %vm626_vm3, %v566_v47, %v648_v52  ;;  %v680_v0 = vpack.c.bf16 %v666_v57, %v665_v55  ;;  %v1016_v13 = vadd.f32 %v2294_v48, %v2867_v34  ;;  %v1101_v17 = vsel %vm1069_vm4, %v1013_v44, %v1085_v54 }
 0x23f   :  { %v587_v3 = vadd.f32 %v2233_v60, %v2867_v34  ;;  %v578_v6 = vpop.f32.mrb[5].mxu1  ;;  %v679_v7 = vpack.c.bf16 %v664_v62, %v663_v61  ;;  %vm1068_vm6 = vcmp.gt.f32.partialorder %v1008_v1, 0.0  ;;  %v1084_v22 = vmul.f32 %v2872_v35, %v1008_v1 }
 0x240   :  { %v579_v8 = vadd.f32 %v2867_v34, %v578_v6  ;;  %v2234_v10 = vpop.f32.mrb[6].mxu1  ;;  %v2297_v16 = vpop.f32.mrb[36].mxu0  ;;  %vm1070_vm11 = vcmp.gt.f32.partialorder %v1016_v13, 0.0  ;;  %v1086_v43 = vmul.f32 %v2872_v35, %v1016_v13  ;;  %v1099_v47 = vsel %vm1067_vm5, %v1005_v50, %v1083_v11 }
 0x241   :  { %v653_v18 = vmul.f32 %v2872_v35, %v587_v3  ;;  %v590_v20 = vadd.f32 %v2234_v10, %v2867_v34  ;;  %v581_v21 = vpop.f32.mrb[7].mxu1  ;;  %2307 = vmatprep.subr.bf16.mxu1 %v679_v7  ;;  %v1020_v23 = vpop.f32.mrb[37].mxu0  ;;  %vm631_vm7 = vcmp.gt.f32.partialorder %v587_v3, 0.0  ;;  %v2896_v38 = vadd.f32 %v2297_v16, %v2867_v34 }
 0x242   :  { %v651_v36 = vmul.f32 %v2872_v35, %v579_v8  ;;  %v582_v37 = vadd.f32 %v2867_v34, %v581_v21  ;;  %2308 = vmatpush3.bf16.msra.mxu1 %v679_v7  ;;  %v2298_v39 = vpop.f32.mrb[38].mxu0  ;;  %vm629_vm8 = vcmp.gt.f32.partialorder %v579_v8, 0.0  ;;  %v2900_v41 = vadd.f32 %v2867_v34, %v1020_v23 }
 0x243   :  { %vm632_vm9 = vcmp.gt.f32.partialorder %v590_v20, 0.0  ;;  %v654_v40 = vmul.f32 %v2872_v35, %v590_v20  ;;  %2309 = vmatprep.subr.bf16.mxu1 %v680_v0  ;;  %v1023_v24 = vpop.f32.mrb[39].mxu0  ;;  %v669_v44 = vsel %vm631_vm7, %v587_v3, %v653_v18  ;;  %v2906_v46 = vadd.f32 %v2298_v39, %v2867_v34 }
 0x244   :  { %vm630_vm10 = vcmp.gt.f32.partialorder %v582_v37, 0.0  ;;  %v652_v42 = vmul.f32 %v2872_v35, %v582_v37  ;;  %v667_v49 = vsel %vm629_vm8, %v579_v8, %v651_v36  ;;  %v1100_v54 = vsel %vm1068_vm6, %v1008_v1, %v1084_v22 }
 0x245   :  { %v670_v45 = vsel %vm632_vm9, %v590_v20, %v654_v40  ;;  %v2914_v61 = vmul.f32 %v2872_v35, %v2896_v38  ;;  %vm1071_vm12 = vcmp.gt.f32.partialorder %v2900_v41, 0.0  ;;  %v1024_v3 = vadd.f32 %v2867_v34, %v1023_v24 }
 0x246   :  { %v2237_v48 = vpop.f32.mrb[8].mxu1  ;;  %2310 = vmatpush3.bf16.msra.mxu1 %v680_v0  ;;  %v668_v51 = vsel %vm630_vm10, %v582_v37, %v652_v42  ;;  %v682_v52 = vpack.c.bf16 %v670_v45, %v669_v44  ;;  %v1087_v0 = vmul.f32 %v2872_v35, %v2900_v41  ;;  %v2921_v6 = vpack.c.bf16 %v1100_v54, %v1099_v47 }
 0x247   :  { %v603_v55 = vadd.f32 %v2237_v48, %v2867_v34  ;;  %v594_v57 = vpop.f32.mrb[9].mxu1  ;;  %v681_v60 = vpack.c.bf16 %v668_v51, %v667_v49  ;;  %vm1073_vm13 = vcmp.gt.f32.partialorder %v2896_v38, 0.0  ;;  %v2928_v11 = vmul.f32 %v2872_v35, %v2906_v46 }
 0x248   :  { %v595_v50 = vadd.f32 %v2867_v34, %v594_v57  ;;  %v2238_v62 = vpop.f32.mrb[10].mxu1  ;;  %v2301_v1 = vpop.f32.mrb[40].mxu0  ;;  %v1102_v16 = vsel %vm1070_vm11, %v1016_v13, %v1086_v43  ;;  %vm1074_vm15 = vcmp.gt.f32.partialorder %v2906_v46, 0.0  ;;  %v1088_v40 = vmul.f32 %v2872_v35, %v1024_v3 }
 0x249   :  { %v657_v7 = vmul.f32 %v2872_v35, %v603_v55  ;;  %v606_v8 = vadd.f32 %v2238_v62, %v2867_v34  ;;  %v597_v10 = vpop.f32.mrb[11].mxu1  ;;  %2311 = vmatprep.subr.bf16.mxu1 %v681_v60  ;;  %v1036_v18 = vpop.f32.mrb[41].mxu0  ;;  %vm635_vm14 = vcmp.gt.f32.partialorder %v603_v55, 0.0  ;;  %v2934_v22 = vpack.c.bf16 %v1102_v16, %v1101_v17 }
 0x24a   :  { %v655_v20 = vmul.f32 %v2872_v35, %v595_v50  ;;  %v598_v21 = vadd.f32 %v2867_v34, %v597_v10  ;;  %2312 = vmatpush3.bf16.msra.mxu1 %v681_v60  ;;  %v2302_v23 = vpop.f32.mrb[42].mxu0  ;;  %vm633_vm0 = vcmp.gt.f32.partialorder %v595_v50, 0.0  ;;  %v2938_v37 = vadd.f32 %v2301_v1, %v2867_v34 }
 0x24b   :  { %vm636_vm1 = vcmp.gt.f32.partialorder %v606_v8, 0.0  ;;  %v658_v36 = vmul.f32 %v2872_v35, %v606_v8  ;;  %2313 = vmatprep.subr.bf16.mxu1 %v682_v52  ;;  %v1039_v13 = vpop.f32.mrb[43].mxu0  ;;  %v2943_v24 = vadd.f32 %v2867_v34, %v1036_v18  ;;  %v673_v17 = vsel %vm635_vm14, %v603_v55, %v657_v7 }
 0x24c   :  { %vm634_vm2 = vcmp.gt.f32.partialorder %v598_v21, 0.0  ;;  %v656_v39 = vmul.f32 %v2872_v35, %v598_v21  ;;  %vm1072_vm3 = vcmp.gt.f32.partialorder %v1024_v3, 0.0  ;;  %v2947_v43 = vadd.f32 %v2302_v23, %v2867_v34 }
 0x24d   :  { %v674_v42 = vsel %vm636_vm1, %v606_v8, %v658_v36  ;;  %v671_v45 = vsel %vm633_vm0, %v595_v50, %v655_v20  ;;  %v2952_v49 = vmul.f32 %v2872_v35, %v2938_v37  ;;  %v2957_v55 = vmul.f32 %v2872_v35, %v2943_v24 }
 0x24e   :  { %v2241_v44 = vpop.f32.mrb[12].mxu1  ;;  %2314 = vmatpush3.bf16.msra.mxu1 %v682_v52  ;;  %v672_v47 = vsel %vm634_vm2, %v598_v21, %v656_v39  ;;  %v684_v48 = vpack.c.bf16 %v674_v42, %v673_v17  ;;  %v2961_v60 = vmul.f32 %v2872_v35, %v2947_v43  ;;  %vm1075_vm4 = vcmp.gt.f32.partialorder %v2943_v24, 0.0 }
 0x24f   :  { %v619_v51 = vadd.f32 %v2241_v44, %v2867_v34  ;;  %v610_v54 = vpop.f32.mrb[13].mxu1  ;;  %v683_v57 = vpack.c.bf16 %v672_v47, %v671_v45  ;;  %v2966_v62 = vadd.f32 %v2867_v34, %v1039_v13  ;;  %v1103_v1 = vsel %vm1071_vm12, %v2900_v41, %v1087_v0 }
 0x250   :  { %v611_v52 = vadd.f32 %v2867_v34, %v610_v54  ;;  %v2242_v50 = vpop.f32.mrb[14].mxu1  ;;  %v1104_v7 = vsel %vm1072_vm3, %v1024_v3, %v1088_v40  ;;  %v2305_v8 = vpop.f32.mrb[44].mxu0  ;;  %vm1077_vm7 = vcmp.gt.f32.partialorder %v2938_v37, 0.0  ;;  %vm1078_vm10 = vcmp.gt.f32.partialorder %v2947_v43, 0.0 }
 0x251   :  { %vm639_vm5 = vcmp.gt.f32.partialorder %v619_v51, 0.0  ;;  %v661_v10 = vmul.f32 %v2872_v35, %v619_v51  ;;  %v622_v16 = vadd.f32 %v2242_v50, %v2867_v34  ;;  %v613_v18 = vpop.f32.mrb[15].mxu1  ;;  %2315 = vmatprep.subr.bf16.mxu1 %v683_v57  ;;  %v2974_v20 = vpack.c.bf16 %v1104_v7, %v1103_v1  ;;  %v1052_v21 = vpop.f32.mrb[45].mxu0 }
 0x252   :  { %vm637_vm6 = vcmp.gt.f32.partialorder %v611_v52, 0.0  ;;  %v659_v23 = vmul.f32 %v2872_v35, %v611_v52  ;;  %v614_v36 = vadd.f32 %v2867_v34, %v613_v18  ;;  %2316 = vmatpush3.bf16.msra.mxu1 %v683_v57  ;;  %vm1076_vm8 = vcmp.gt.f32.partialorder %v2966_v62, 0.0  ;;  %v2306_v41 = vpop.f32.mrb[46].mxu0 }
 0x253   :  { %vm640_vm9 = vcmp.gt.f32.partialorder %v622_v16, 0.0  ;;  %v662_v0 = vmul.f32 %v2872_v35, %v622_v16  ;;  %2317 = vmatprep.subr.bf16.mxu1 %v684_v48  ;;  %v677_v3 = vsel %vm639_vm5, %v619_v51, %v661_v10  ;;  %v1092_v13 = vmul.f32 %v2872_v35, %v2966_v62  ;;  %v1055_v39 = vpop.f32.mrb[47].mxu0 }
 0x254   :  { %vm638_vm11 = vcmp.gt.f32.partialorder %v614_v36, 0.0  ;;  %v660_v40 = vmul.f32 %v2872_v35, %v614_v36  ;;  %v675_v17 = vsel %vm637_vm6, %v611_v52, %v659_v23  ;;  %v1105_v42 = vsel %vm1073_vm13, %v2896_v38, %v2914_v61 }
 0x255   :  { %v678_v44 = vsel %vm640_vm9, %v622_v16, %v662_v0  ;;  %v1106_v45 = vsel %vm1074_vm15, %v2906_v46, %v2928_v11  ;;  %v1061_v47 = vadd.f32 %v2305_v8, %v2867_v34  ;;  %v1053_v51 = vadd.f32 %v2867_v34, %v1052_v21 }
 0x256   :  { %v2261_v54 = vpop.f32.mrb[16].mxu1  ;;  %2318 = vmatpush3.bf16.msra.mxu1 %v684_v48  ;;  %v676_v57 = vsel %vm638_vm11, %v614_v36, %v660_v40  ;;  %v686_v50 = vpack.c.bf16 %v678_v44, %v677_v3  ;;  %v2997_v52 = vpack.c.bf16 %v1106_v45, %v1105_v42  ;;  %v1064_v1 = vadd.f32 %v2306_v41, %v2867_v34 }
 0x257   :  { %v795_v38 = vadd.f32 %v2261_v54, %v2867_v34  ;;  %v786_v61 = vpop.f32.mrb[17].mxu1  ;;  %v685_v7 = vpack.c.bf16 %v676_v57, %v675_v17  ;;  %vm1081_vm12 = vcmp.gt.f32.partialorder %v1061_v47, 0.0  ;;  %v1097_v10 = vmul.f32 %v2872_v35, %v1061_v47 }
 0x258   :  { %v787_v46 = vadd.f32 %v2867_v34, %v786_v61  ;;  %v2262_v11 = vpop.f32.mrb[18].mxu1  ;;  %vm1079_vm13 = vcmp.gt.f32.partialorder %v1053_v51, 0.0  ;;  %v1095_v8 = vmul.f32 %v2872_v35, %v1053_v51  ;;  %vm1082_vm14 = vcmp.gt.f32.partialorder %v1064_v1, 0.0 }
 0x259   :  { %vm851_vm15 = vcmp.gt.f32.partialorder %v795_v38, 0.0  ;;  %v867_v48 = vmul.f32 %v2872_v35, %v795_v38  ;;  %v798_v16 = vadd.f32 %v2262_v11, %v2867_v34  ;;  %v789_v18 = vpop.f32.mrb[19].mxu1  ;;  %2319 = vmatprep.subr.bf16.mxu1 %v685_v7  ;;  %v1098_v21 = vmul.f32 %v2872_v35, %v1064_v1 }
 0x25a   :  { %vm849_vm0 = vcmp.gt.f32.partialorder %v787_v46, 0.0  ;;  %v865_v23 = vmul.f32 %v2872_v35, %v787_v46  ;;  %v790_v36 = vadd.f32 %v2867_v34, %v789_v18  ;;  %2320 = vmatpush3.bf16.msra.mxu1 %v685_v7  ;;  %v1056_v41 = vadd.f32 %v2867_v34, %v1055_v39 }
 0x25b   :  { %vm852_vm1 = vcmp.gt.f32.partialorder %v798_v16, 0.0  ;;  %v868_v0 = vmul.f32 %v2872_v35, %v798_v16  ;;  %2321 = vmatprep.subr.bf16.mxu1 %v686_v50  ;;  %v883_v3 = vsel %vm851_vm15, %v795_v38, %v867_v48  ;;  %v1107_v40 = vsel %vm1075_vm4, %v2943_v24, %v2957_v55 }
 0x25c   :  { %vm850_vm2 = vcmp.gt.f32.partialorder %v790_v36, 0.0  ;;  %v866_v17 = vmul.f32 %v2872_v35, %v790_v36  ;;  %v881_v42 = vsel %vm849_vm0, %v787_v46, %v865_v23  ;;  %vm1080_vm3 = vcmp.gt.f32.partialorder %v1056_v41, 0.0 }
 0x25d   :  { %v884_v44 = vsel %vm852_vm1, %v798_v16, %v868_v0  ;;  %v1096_v45 = vmul.f32 %v2872_v35, %v1056_v41  ;;  %v1108_v39 = vsel %vm1076_vm8, %v2966_v62, %v1092_v13  ;;  %v1109_v54 = vsel %vm1077_vm7, %v2938_v37, %v2952_v49 }
 0x25e   :  { %v2265_v57 = vpop.f32.mrb[20].mxu1  ;;  %2322 = vmatpush3.bf16.msra.mxu1 %v686_v50  ;;  %v882_v24 = vsel %vm850_vm2, %v790_v36, %v866_v17  ;;  %v898_v55 = vpack.c.bf16 %v884_v44, %v883_v3  ;;  %v3024_v38 = vpack.c.bf16 %v1108_v39, %v1107_v40  ;;  %v1110_v61 = vsel %vm1078_vm10, %v2947_v43, %v2961_v60 }
 0x25f   :  { %v811_v7 = vadd.f32 %v2265_v57, %v2867_v34  ;;  %v802_v46 = vpop.f32.mrb[21].mxu1  ;;  %v897_v62 = vpack.c.bf16 %v882_v24, %v881_v42  ;;  %2371 = vmatprep.subr.bf16.mxu1 %v2921_v6  ;;  %v3032_v13 = vpack.c.bf16 %v1110_v61, %v1109_v54  ;;  %v1111_v37 = vsel %vm1079_vm13, %v1053_v51, %v1095_v8 }
 0x260   :  { %v803_v49 = vadd.f32 %v2867_v34, %v802_v46  ;;  %v2266_v50 = vpop.f32.mrb[22].mxu1  ;;  %v1112_v11 = vsel %vm1080_vm3, %v1056_v41, %v1096_v45  ;;  %v1113_v48 = vsel %vm1081_vm12, %v1061_v47, %v1097_v10  ;;  %v1114_v16 = vsel %vm1082_vm14, %v1064_v1, %v1098_v21 }
 0x261   :  { %v871_v43 = vmul.f32 %v2872_v35, %v811_v7  ;;  %v814_v60 = vadd.f32 %v2266_v50, %v2867_v34  ;;  %v805_v18 = vpop.f32.mrb[23].mxu1  ;;  %2324 = vmatmul.mubr.bf16.vlgmr.msra.gmra.mrb[32].mxu1 %v2800_v53  ;;  %2339 = vmatprep.subr.bf16.mxu0 %v897_v62  ;;  %v3042_v23 = vpack.c.bf16 %v1112_v11, %v1111_v37  ;;  %vm855_vm4 = vcmp.gt.f32.partialorder %v811_v7, 0.0 }
 0x262   :  { %v869_v51 = vmul.f32 %v2872_v35, %v803_v49  ;;  %v806_v8 = vadd.f32 %v2867_v34, %v805_v18  ;;  %2340 = vmatpush3.bf16.msra.mxu0 %v897_v62  ;;  %2327 = vmatprep.mubr.bf16.mxu1 %v2802_v56  ;;  %v3047_v47 = vpack.c.bf16 %v1114_v16, %v1113_v48  ;;  %vm853_vm5 = vcmp.gt.f32.partialorder %v803_v49, 0.0 }
 0x263   :  { %vm856_vm6 = vcmp.gt.f32.partialorder %v814_v60, 0.0  ;;  %v872_v1 = vmul.f32 %v2872_v35, %v814_v60  ;;  %2341 = vmatprep.subr.bf16.mxu0 %v898_v55  ;;  %2372 = vmatpush3.bf16.msra.mxu1 %v2921_v6  ;;  %v887_v10 = vsel %vm855_vm4, %v811_v7, %v871_v43 }
 0x264   :  { %vm854_vm7 = vcmp.gt.f32.partialorder %v806_v8, 0.0  ;;  %v870_v53 = vmul.f32 %v2872_v35, %v806_v8  ;;  %2373 = vmatprep.subr.bf16.mxu1 %v2934_v22  ;;  %v885_v41 = vsel %vm853_vm5, %v803_v49, %v869_v51 }
 0x265   :  { %v888_v21 = vsel %vm856_vm6, %v814_v60, %v872_v1 }
 0x266   :  { %v2269_v36 = vpop.f32.mrb[24].mxu1  ;;  %2342 = vmatpush3.bf16.msra.mxu0 %v898_v55  ;;  %v886_v56 = vsel %vm854_vm7, %v806_v8, %v870_v53  ;;  %v900_v0 = vpack.c.bf16 %v888_v21, %v887_v10 }
 0x267   :  { %v827_v3 = vadd.f32 %v2269_v36, %v2867_v34  ;;  %v818_v40 = vpop.f32.mrb[25].mxu1  ;;  %v899_v17 = vpack.c.bf16 %v886_v56, %v885_v41  ;;  %2374 = vmatpush3.bf16.msra.mxu1 %v2934_v22 }
 0x268   :  { %v819_v6 = vadd.f32 %v2867_v34, %v818_v40  ;;  %v2270_v42 = vpop.f32.mrb[26].mxu1  ;;  %2375 = vmatprep.subr.bf16.mxu1 %v2974_v20 }
 0x269   :  { %v875_v44 = vmul.f32 %v2872_v35, %v827_v3  ;;  %v830_v45 = vadd.f32 %v2270_v42, %v2867_v34  ;;  %v821_v39 = vpop.f32.mrb[27].mxu1  ;;  %2328 = vmatmul.mubr.bf16.gmra.mrb[36].mxu1 %v2812_v63  ;;  %2343 = vmatprep.subr.bf16.mxu0 %v899_v17  ;;  %vm859_vm8 = vcmp.gt.f32.partialorder %v827_v3, 0.0 }
 0x26a   :  { %v873_v54 = vmul.f32 %v2872_v35, %v819_v6  ;;  %v822_v57 = vadd.f32 %v2867_v34, %v821_v39  ;;  %2344 = vmatpush3.bf16.msra.mxu0 %v899_v17  ;;  %2331 = vmatprep.mubr.bf16.mxu1 %v2814_v2  ;;  %vm857_vm9 = vcmp.gt.f32.partialorder %v819_v6, 0.0 }
 0x26b   :  { %vm860_vm10 = vcmp.gt.f32.partialorder %v830_v45, 0.0  ;;  %v876_v22 = vmul.f32 %v2872_v35, %v830_v45  ;;  %2345 = vmatprep.subr.bf16.mxu0 %v900_v0  ;;  %2376 = vmatpush3.bf16.msra.mxu1 %v2974_v20  ;;  %v891_v63 = vsel %vm859_vm8, %v827_v3, %v875_v44 }
 0x26c   :  { %vm858_vm11 = vcmp.gt.f32.partialorder %v822_v57, 0.0  ;;  %v874_v24 = vmul.f32 %v2872_v35, %v822_v57  ;;  %2377 = vmatprep.subr.bf16.mxu1 %v2997_v52  ;;  %v889_v7 = vsel %vm857_vm9, %v819_v6, %v873_v54 }
 0x26d   :  { %v892_v55 = vsel %vm860_vm10, %v830_v45, %v876_v22 }
 0x26e   :  { %v2273_v61 = vpop.f32.mrb[28].mxu1  ;;  %2346 = vmatpush3.bf16.msra.mxu0 %v900_v0  ;;  %v890_v46 = vsel %vm858_vm11, %v822_v57, %v874_v24  ;;  %v902_v62 = vpack.c.bf16 %v892_v55, %v891_v63 }
 0x26f   :  { %v843_v2 = vadd.f32 %v2273_v61, %v2867_v34  ;;  %v834_v37 = vpop.f32.mrb[29].mxu1  ;;  %v901_v49 = vpack.c.bf16 %v890_v46, %v889_v7  ;;  %2378 = vmatpush3.bf16.msra.mxu1 %v2997_v52 }
 0x270   :  { %v835_v20 = vadd.f32 %v2867_v34, %v834_v37  ;;  %v2274_v50 = vpop.f32.mrb[30].mxu1  ;;  %2379 = vmatprep.subr.bf16.mxu1 %v3024_v38 }
 0x271   :  { %v879_v11 = vmul.f32 %v2872_v35, %v843_v2  ;;  %v846_v48 = vadd.f32 %v2274_v50, %v2867_v34  ;;  %v837_v16 = vpop.f32.mrb[31].mxu1  ;;  %2332 = vmatmul.mubr.bf16.gmra.mrb[40].mxu1 %v2824_v9  ;;  %2347 = vmatprep.subr.bf16.mxu0 %v901_v49  ;;  %vm863_vm12 = vcmp.gt.f32.partialorder %v843_v2, 0.0 }
 0x272   :  { %v877_v43 = vmul.f32 %v2872_v35, %v835_v20  ;;  %v838_v60 = vadd.f32 %v2867_v34, %v837_v16  ;;  %2348 = vmatpush3.bf16.msra.mxu0 %v901_v49  ;;  %2335 = vmatprep.mubr.bf16.mxu1 %v2826_v12  ;;  %vm861_vm13 = vcmp.gt.f32.partialorder %v835_v20, 0.0  ;;  %v2540_v12 = vld [vmem:[#allocation8] sm:$0xff]  }
 0x273   :  { %vm864_vm14 = vcmp.gt.f32.partialorder %v846_v48, 0.0  ;;  %v880_v52 = vmul.f32 %v2872_v35, %v846_v48  ;;  %2349 = vmatprep.subr.bf16.mxu0 %v902_v62  ;;  %2380 = vmatpush3.bf16.msra.mxu1 %v3024_v38  ;;  %v895_v9 = vsel %vm863_vm12, %v843_v2, %v879_v11 }
 0x274   :  { %vm862_vm15 = vcmp.gt.f32.partialorder %v838_v60, 0.0  ;;  %v878_v18 = vmul.f32 %v2872_v35, %v838_v60  ;;  %2381 = vmatprep.subr.bf16.mxu1 %v3032_v13  ;;  %v893_v8 = vsel %vm861_vm13, %v835_v20, %v877_v43  ;;  %v2541_v35 = vld [vmem:[#allocation8 + $0x8] sm:$0xff]  }
 0x275   :  { %v896_v51 = vsel %vm864_vm14, %v846_v48, %v880_v52 }
 0x276   :  { %2350 = vmatpush3.bf16.msra.mxu0 %v902_v62  ;;  %v894_v34 = vsel %vm862_vm15, %v838_v60, %v878_v18  ;;  %v904_v1 = vpack.c.bf16 %v896_v51, %v895_v9 }
 0x277   :  { %v903_v53 = vpack.c.bf16 %v894_v34, %v893_v8  ;;  %2382 = vmatpush3.bf16.msra.mxu1 %v3032_v13 }
 0x278   :  { %2383 = vmatprep.subr.bf16.mxu1 %v3042_v23 }
 0x279   :  { %2336 = vmatmul.mubr.bf16.gmra.mrb[44].mxu1 %v2836_v19  ;;  %2351 = vmatprep.subr.bf16.mxu0 %v903_v53  ;;  %v2543_v19 = vld [vmem:[#allocation8 + $0x18] sm:$0xff]  }
 0x27a   :  { %2352 = vmatpush3.bf16.msra.mxu0 %v903_v53  ;;  %2387 = vmatprep.mubr.bf16.mxu1 %v2797_v25  ;;  %v2542_v25 = vld [vmem:[#allocation8 + $0x10] sm:$0xff]  }
 0x27b   :  { %2353 = vmatprep.subr.bf16.mxu0 %v904_v1  ;;  %2384 = vmatpush3.bf16.msra.mxu1 %v3042_v23 }
 0x27c   :  { %2385 = vmatprep.subr.bf16.mxu1 %v3047_v47 }
 0x27e   :  { %2354 = vmatpush3.bf16.msra.mxu0 %v904_v1 }
 0x27f   :  { %2386 = vmatpush3.bf16.msra.mxu1 %v3047_v47  ;;  %2403 = vmatprep.subr.bf16.mxu0 %v2540_v12 }
 0x280   :  { %2467 = vmatprep.subr.bf16.mxu1 %v2540_v12 }
 0x281   :  { %2356 = vmatmul.mubr.bf16.vlgmr.msra.gmra.mrb[48].mxu0 %v2842_v27 }
 0x282   :  { %2359 = vmatprep.mubr.bf16.mxu0 %v2844_v28  ;;  %2388 = vmatmul.mubr.bf16.vlgmr.msra.gmra.mrb[48].mxu1 %v2804_v58  ;;  %v2544_v58 = vld [vmem:[#allocation8 + $0x20] sm:$0xff]  }
 0x283   :  { %2391 = vmatprep.mubr.bf16.mxu1 %v2806_v59  ;;  %2404 = vmatpush3.bf16.msra.mxu0 %v2540_v12  ;;  %v2545_v59 = vld [vmem:[#allocation8 + $0x28] sm:$0xff]  }
 0x284   :  { %2405 = vmatprep.subr.bf16.mxu0 %v2541_v35  ;;  %2475 = vmatpush3.bf16.msra.mxu1 %v2540_v12 }
 0x285   :  { %2468 = vmatprep.subr.bf16.mxu1 %v2541_v35 }
 0x287   :  { %2406 = vmatpush3.bf16.msra.mxu0 %v2541_v35 }
 0x288   :  { %2407 = vmatprep.subr.bf16.mxu0 %v2542_v25  ;;  %2476 = vmatpush3.bf16.msra.mxu1 %v2541_v35 }
 0x289   :  { %2360 = vmatmul.mubr.bf16.gmra.mrb[52].mxu0 %v2848_v29  ;;  %2469 = vmatprep.subr.bf16.mxu1 %v2542_v25 }
 0x28a   :  { %2363 = vmatprep.mubr.bf16.mxu0 %v2850_v30  ;;  %2392 = vmatmul.mubr.bf16.gmra.mrb[52].mxu1 %v2816_v4  ;;  %v2546_v4 = vld [vmem:[#allocation8 + $0x30] sm:$0xff]  }
 0x28b   :  { %2395 = vmatprep.mubr.bf16.mxu1 %v2818_v5  ;;  %2408 = vmatpush3.bf16.msra.mxu0 %v2542_v25  ;;  %v2547_v5 = vld [vmem:[#allocation8 + $0x38] sm:$0xff]  }
 0x28c   :  { %2409 = vmatprep.subr.bf16.mxu0 %v2543_v19  ;;  %2477 = vmatpush3.bf16.msra.mxu1 %v2542_v25 }
 0x28d   :  { %2470 = vmatprep.subr.bf16.mxu1 %v2543_v19 }
 0x28f   :  { %2410 = vmatpush3.bf16.msra.mxu0 %v2543_v19 }
 0x290   :  { %2411 = vmatprep.subr.bf16.mxu0 %v2544_v58  ;;  %2478 = vmatpush3.bf16.msra.mxu1 %v2543_v19 }
 0x291   :  { %2364 = vmatmul.mubr.bf16.gmra.mrb[56].mxu0 %v2854_v31  ;;  %2471 = vmatprep.subr.bf16.mxu1 %v2544_v58 }
 0x292   :  { %2367 = vmatprep.mubr.bf16.mxu0 %v2856_v32  ;;  %2396 = vmatmul.mubr.bf16.gmra.mrb[56].mxu1 %v2828_v14 }
 0x293   :  { %2399 = vmatprep.mubr.bf16.mxu1 %v2830_v15  ;;  %2412 = vmatpush3.bf16.msra.mxu0 %v2544_v58 }
 0x294   :  { %2413 = vmatprep.subr.bf16.mxu0 %v2545_v59  ;;  %2479 = vmatpush3.bf16.msra.mxu1 %v2544_v58 }
 0x295   :  { %2472 = vmatprep.subr.bf16.mxu1 %v2545_v59 }
 0x297   :  { %2414 = vmatpush3.bf16.msra.mxu0 %v2545_v59 }
 0x298   :  { %2415 = vmatprep.subr.bf16.mxu0 %v2546_v4  ;;  %2480 = vmatpush3.bf16.msra.mxu1 %v2545_v59 }
 0x299   :  { %2368 = vmatmul.mubr.bf16.gmra.mrb[60].mxu0 %v2860_v33  ;;  %2473 = vmatprep.subr.bf16.mxu1 %v2546_v4 }
 0x29a   :  { %2400 = vmatmul.mubr.bf16.gmra.mrb[60].mxu1 %v2838_v26 }
 0x29b   :  { %2416 = vmatpush3.bf16.msra.mxu0 %v2546_v4 }
 0x29c   :  { %2481 = vmatpush3.bf16.msra.mxu1 %v2546_v4  ;;  %2417 = vmatprep.subr.bf16.mxu0 %v2547_v5 }
 0x29d   :  { %2474 = vmatprep.subr.bf16.mxu1 %v2547_v5 }
 0x29f   :  { %2418 = vmatpush3.bf16.msra.mxu0 %v2547_v5 }
 0x2a0   :  { %2482 = vmatpush3.bf16.msra.mxu1 %v2547_v5 }
 0x334   :  { %v2325_v14 = vpop.f32.mrb[32].mxu1 }
 0x335   :  { %v1157_v15 = vpop.f32.mrb[33].mxu1 }
 0x336   :  { %v2326_v27 = vpop.f32.mrb[34].mxu1 }
 0x337   :  { %v1221_v28 = vpack.c.bf16 %v2326_v27, %v2325_v14  ;;  %v1160_v29 = vpop.f32.mrb[35].mxu1 }
 0x338   :  { %v1220_v30 = vpack.c.bf16 %v1160_v29, %v1157_v15 }
 0x33a   :  { %2419 = vmatprep.mubr.bf16.mxu0 %v1220_v30 }
 0x33b   :  { %2420 = vmatmul.mubr.bf16.vlgmr.msra.gmra.mrb[64].mxu0 %v1221_v28 }
 0x33c   :  { %v2329_v31 = vpop.f32.mrb[36].mxu1 }
 0x33d   :  { %v1173_v32 = vpop.f32.mrb[37].mxu1 }
 0x33e   :  { %v2330_v33 = vpop.f32.mrb[38].mxu1 }
 0x33f   :  { %v1223_v38 = vpack.c.bf16 %v2330_v33, %v2329_v31  ;;  %v1176_v26 = vpop.f32.mrb[39].mxu1  ;;  %v3105_v33 = vld [vmem:[%s3225_s5] ss:$0 sm:$0xff]  ;;  %s2672_s5 = smov [#allocation10]  }
 0x340   :  { %v1222_v13 = vpack.c.bf16 %v1176_v26, %v1173_v32 }
 0x342   :  { %2423 = vmatprep.mubr.bf16.mxu0 %v1222_v13 }
 0x343   :  { %2424 = vmatmul.mubr.bf16.gmra.mrb[68].mxu0 %v1223_v38  ;;  %v3110_v38 = vld [vmem:[%s3227_s7] ss:$0 sm:$0xff]  ;;  %s1937_s7 = sshll.u32 %s2672_s5, 4  ;;  %s1938_s7 = int_to_ptr.vmem [resolvable:$true] %s1937_s7 }
 0x344   :  { %v2333_v23 = vpop.f32.mrb[40].mxu1  ;;  %s2636_s13 = scalar_lea.vmem %s1938_s7, 6144  ;;  %p2641_p5 = scmp.lt.s32.totalorder %s1938_s7, %s1938_s7 }
 0x345   :  { %v1189_v47 = vpop.f32.mrb[41].mxu1  ;;  %p2637_p4 = scmp.ne.s32.totalorder %s1938_s7, %s2636_s13  ;;  %p2642_p6 = scmp.lt.s32.totalorder %s2636_s13, %s2636_s13 }
 0x346   :  { %v2334_v10 = vpop.f32.mrb[42].mxu1 }
 0x347   :  { %v1225_v21 = vpack.c.bf16 %v2334_v10, %v2333_v23  ;;  %v1192_v36 = vpop.f32.mrb[43].mxu1  ;;  %p2643_p7 = por %p2642_p6, %p2641_p5 }
 0x348   :  { %v1224_v41 = vpack.c.bf16 %v1192_v36, %v1189_v47 }
 0x349   :  { %p2644_p8 = pnand %p2643_p7, %p2637_p4 }
 0x34a   :  { %2427 = vmatprep.mubr.bf16.mxu0 %v1224_v41 }
 0x34b   :  { %2428 = vmatmul.mubr.bf16.gmra.mrb[72].mxu0 %v1225_v21 }
 0x34c   :  { %v2337_v56 = vpop.f32.mrb[44].mxu1 }
 0x34d   :  { %v1205_v0 = vpop.f32.mrb[45].mxu1 }
 0x34e   :  { %v2338_v3 = vpop.f32.mrb[46].mxu1 }
 0x34f   :  { %v1227_v40 = vpack.c.bf16 %v2338_v3, %v2337_v56  ;;  %v1208_v17 = vpop.f32.mrb[47].mxu1 }
 0x350   :  { %v1226_v6 = vpack.c.bf16 %v1208_v17, %v1205_v0 }
 0x352   :  { %2431 = vmatprep.mubr.bf16.mxu0 %v1226_v6 }
 0x353   :  { %2432 = vmatmul.mubr.bf16.gmra.mrb[76].mxu0 %v1227_v40 }
 0x354   :  { %v2357_v42 = vpop.f32.mrb[48].mxu0 }
 0x355   :  { %v1262_v44 = vpop.f32.mrb[49].mxu0  ;;  %v2389_v45 = vpop.f32.mrb[48].mxu1 }
 0x356   :  { %v2358_v39 = vpop.f32.mrb[50].mxu0  ;;  %v1367_v54 = vpop.f32.mrb[49].mxu1 }
 0x357   :  { %v1326_v57 = vpack.c.bf16 %v2358_v39, %v2357_v42  ;;  %v1265_v22 = vpop.f32.mrb[51].mxu0  ;;  %v2390_v24 = vpop.f32.mrb[50].mxu1 }
 0x358   :  { %v1325_v63 = vpack.c.bf16 %v1265_v22, %v1262_v44  ;;  %v1431_v55 = vpack.c.bf16 %v2390_v24, %v2389_v45  ;;  %v1370_v61 = vpop.f32.mrb[51].mxu1 }
 0x359   :  { %v1430_v7 = vpack.c.bf16 %v1370_v61, %v1367_v54 }
 0x35a   :  { %2435 = vmatprep.mubr.bf16.mxu0 %v1325_v63 }
 0x35b   :  { %2436 = vmatmul.mubr.bf16.gmra.mrb[80].mxu0 %v1326_v57 }
 0x35c   :  { %v2361_v46 = vpop.f32.mrb[52].mxu0 }
 0x35d   :  { %v1278_v62 = vpop.f32.mrb[53].mxu0  ;;  %v2393_v2 = vpop.f32.mrb[52].mxu1 }
 0x35e   :  { %v2362_v37 = vpop.f32.mrb[54].mxu0  ;;  %v1383_v49 = vpop.f32.mrb[53].mxu1 }
 0x35f   :  { %v1328_v20 = vpack.c.bf16 %v2362_v37, %v2361_v46  ;;  %v1281_v50 = vpop.f32.mrb[55].mxu0  ;;  %v2394_v11 = vpop.f32.mrb[54].mxu1 }
 0x360   :  { %v1327_v48 = vpack.c.bf16 %v1281_v50, %v1278_v62  ;;  %v1433_v16 = vpack.c.bf16 %v2394_v11, %v2393_v2  ;;  %v1386_v43 = vpop.f32.mrb[55].mxu1 }
 0x361   :  { %v1432_v60 = vpack.c.bf16 %v1386_v43, %v1383_v49 }
 0x362   :  { %2439 = vmatprep.mubr.bf16.mxu0 %v1327_v48 }
 0x363   :  { %2440 = vmatmul.mubr.bf16.gmra.mrb[84].mxu0 %v1328_v20 }
 0x364   :  { %v2365_v52 = vpop.f32.mrb[56].mxu0 }
 0x365   :  { %v1294_v18 = vpop.f32.mrb[57].mxu0  ;;  %v2397_v9 = vpop.f32.mrb[56].mxu1 }
 0x366   :  { %v2366_v51 = vpop.f32.mrb[58].mxu0  ;;  %v1399_v8 = vpop.f32.mrb[57].mxu1 }
 0x367   :  { %v1330_v34 = vpack.c.bf16 %v2366_v51, %v2365_v52  ;;  %v1297_v1 = vpop.f32.mrb[59].mxu0  ;;  %v2398_v53 = vpop.f32.mrb[58].mxu1 }
 0x368   :  { %v1329_v12 = vpack.c.bf16 %v1297_v1, %v1294_v18  ;;  %v1435_v35 = vpack.c.bf16 %v2398_v53, %v2397_v9  ;;  %v1402_v25 = vpop.f32.mrb[59].mxu1 }
 0x369   :  { %v1434_v19 = vpack.c.bf16 %v1402_v25, %v1399_v8 }
 0x36a   :  { %2443 = vmatprep.mubr.bf16.mxu1 %v1329_v12 }
 0x36b   :  { %2444 = vmatmul.mubr.bf16.vlgmr.msra.gmra.mrb[64].mxu1 %v1330_v34 }
 0x36c   :  { %v2369_v58 = vpop.f32.mrb[60].mxu0 }
 0x36d   :  { %v1310_v59 = vpop.f32.mrb[61].mxu0  ;;  %v2401_v4 = vpop.f32.mrb[60].mxu1 }
 0x36e   :  { %v2370_v5 = vpop.f32.mrb[62].mxu0  ;;  %v1415_v14 = vpop.f32.mrb[61].mxu1 }
 0x36f   :  { %v1332_v15 = vpack.c.bf16 %v2370_v5, %v2369_v58  ;;  %v1313_v27 = vpop.f32.mrb[63].mxu0  ;;  %v2402_v28 = vpop.f32.mrb[62].mxu1 }
 0x370   :  { %v1331_v29 = vpack.c.bf16 %v1313_v27, %v1310_v59  ;;  %v1437_v30 = vpack.c.bf16 %v2402_v28, %v2401_v4  ;;  %v1418_v31 = vpop.f32.mrb[63].mxu1 }
 0x371   :  { %v1436_v32 = vpack.c.bf16 %v1418_v31, %v1415_v14 }
 0x372   :  { %2447 = vmatprep.mubr.bf16.mxu1 %v1331_v29 }
 0x373   :  { %2448 = vmatmul.mubr.bf16.gmra.mrb[68].mxu1 %v1332_v15 }
 0x374   :  { %2451 = vmatprep.mubr.bf16.mxu1 %v1430_v7 }
 0x37b   :  { %2452 = vmatmul.mubr.bf16.gmra.mrb[72].mxu1 %v1431_v55 }
 0x37c   :  { %2455 = vmatprep.mubr.bf16.mxu1 %v1432_v60 }
 0x383   :  { %2456 = vmatmul.mubr.bf16.gmra.mrb[76].mxu1 %v1433_v16 }
 0x384   :  { %2459 = vmatprep.mubr.bf16.mxu1 %v1434_v19 }
 0x38b   :  { %2460 = vmatmul.mubr.bf16.gmra.mrb[80].mxu1 %v1435_v35 }
 0x38c   :  { %2463 = vmatprep.mubr.bf16.mxu1 %v1436_v32 }
 0x393   :  { %2464 = vmatmul.mubr.bf16.gmra.mrb[84].mxu1 %v1437_v30 }
 0x40e   :  { %v2421_v26 = vpop.f32.mrb[64].mxu0 }
 0x40f   :  { %v1552_v13 = vadd.f32 %v2421_v26, %v3105_v33  ;;  %v1543_v23 = vpop.f32.mrb[65].mxu0 }
 0x410   :  { %v1544_v47 = vadd.f32 %v3105_v33, %v1543_v23  ;;  %v2422_v10 = vpop.f32.mrb[66].mxu0 }
 0x411   :  { %vm1736_vm0 = vcmp.gt.f32.partialorder %v1552_v13, 0.0  ;;  %v1790_v21 = vmul.f32 %v3110_v38, %v1552_v13  ;;  %v1555_v36 = vadd.f32 %v2422_v10, %v3105_v33  ;;  %v1546_v41 = vpop.f32.mrb[67].mxu0 }
 0x412   :  { %vm1734_vm1 = vcmp.gt.f32.partialorder %v1544_v47, 0.0  ;;  %v1788_v56 = vmul.f32 %v3110_v38, %v1544_v47  ;;  %v1547_v0 = vadd.f32 %v3105_v33, %v1546_v41 }
 0x413   :  { %v1838_v3 = vsel %vm1736_vm0, %v1552_v13, %v1790_v21  ;;  %vm1737_vm2 = vcmp.gt.f32.partialorder %v1555_v36, 0.0  ;;  %v1791_v40 = vmul.f32 %v3110_v38, %v1555_v36 }
 0x414   :  { %1886 = vst [vmem:[#allocation10 + $0x10] sm:$0xff] %v1838_v3  ;;  %v1836_v17 = vsel %vm1734_vm1, %v1544_v47, %v1788_v56  ;;  %vm1735_vm3 = vcmp.gt.f32.partialorder %v1547_v0, 0.0  ;;  %v1789_v6 = vmul.f32 %v3110_v38, %v1547_v0 }
 0x415   :  { %1884 = vst [vmem:[#allocation10] sm:$0xff] %v1836_v17  ;;  %v1839_v42 = vsel %vm1737_vm2, %v1555_v36, %v1791_v40 }
 0x416   :  { %1887 = vst [vmem:[#allocation10 + $0x18] sm:$0xff] %v1839_v42  ;;  %v1837_v44 = vsel %vm1735_vm3, %v1547_v0, %v1789_v6  ;;  %v2425_v45 = vpop.f32.mrb[68].mxu0 }
 0x417   :  { %1885 = vst [vmem:[#allocation10 + $0x8] sm:$0xff] %v1837_v44  ;;  %v1568_v39 = vadd.f32 %v2425_v45, %v3105_v33  ;;  %v1559_v54 = vpop.f32.mrb[69].mxu0 }
 0x418   :  { %v1560_v57 = vadd.f32 %v3105_v33, %v1559_v54  ;;  %v2426_v22 = vpop.f32.mrb[70].mxu0 }
 0x419   :  { %vm1740_vm4 = vcmp.gt.f32.partialorder %v1568_v39, 0.0  ;;  %v1794_v24 = vmul.f32 %v3110_v38, %v1568_v39  ;;  %v1571_v63 = vadd.f32 %v2426_v22, %v3105_v33  ;;  %v1562_v55 = vpop.f32.mrb[71].mxu0 }
 0x41a   :  { %vm1738_vm5 = vcmp.gt.f32.partialorder %v1560_v57, 0.0  ;;  %v1792_v61 = vmul.f32 %v3110_v38, %v1560_v57  ;;  %v1563_v7 = vadd.f32 %v3105_v33, %v1562_v55 }
 0x41b   :  { %v1842_v46 = vsel %vm1740_vm4, %v1568_v39, %v1794_v24  ;;  %vm1741_vm6 = vcmp.gt.f32.partialorder %v1571_v63, 0.0  ;;  %v1795_v62 = vmul.f32 %v3110_v38, %v1571_v63 }
 0x41c   :  { %1890 = vst [vmem:[#allocation10 + $0x30] sm:$0xff] %v1842_v46  ;;  %v1840_v2 = vsel %vm1738_vm5, %v1560_v57, %v1792_v61  ;;  %vm1739_vm7 = vcmp.gt.f32.partialorder %v1563_v7, 0.0  ;;  %v1793_v37 = vmul.f32 %v3110_v38, %v1563_v7 }
 0x41d   :  { %1888 = vst [vmem:[#allocation10 + $0x20] sm:$0xff] %v1840_v2  ;;  %v1843_v49 = vsel %vm1741_vm6, %v1571_v63, %v1795_v62 }
 0x41e   :  { %1891 = vst [vmem:[#allocation10 + $0x38] sm:$0xff] %v1843_v49  ;;  %v1841_v20 = vsel %vm1739_vm7, %v1563_v7, %v1793_v37  ;;  %v2429_v50 = vpop.f32.mrb[72].mxu0 }
 0x41f   :  { %1889 = vst [vmem:[#allocation10 + $0x28] sm:$0xff] %v1841_v20  ;;  %v1584_v11 = vadd.f32 %v2429_v50, %v3105_v33  ;;  %v1575_v48 = vpop.f32.mrb[73].mxu0 }
 0x420   :  { %v1576_v16 = vadd.f32 %v3105_v33, %v1575_v48  ;;  %v2430_v43 = vpop.f32.mrb[74].mxu0 }
 0x421   :  { %vm1744_vm8 = vcmp.gt.f32.partialorder %v1584_v11, 0.0  ;;  %v1798_v60 = vmul.f32 %v3110_v38, %v1584_v11  ;;  %v1587_v52 = vadd.f32 %v2430_v43, %v3105_v33  ;;  %v1578_v18 = vpop.f32.mrb[75].mxu0 }
 0x422   :  { %vm1742_vm9 = vcmp.gt.f32.partialorder %v1576_v16, 0.0  ;;  %v1796_v9 = vmul.f32 %v3110_v38, %v1576_v16  ;;  %v1579_v51 = vadd.f32 %v3105_v33, %v1578_v18 }
 0x423   :  { %v1846_v8 = vsel %vm1744_vm8, %v1584_v11, %v1798_v60  ;;  %vm1745_vm10 = vcmp.gt.f32.partialorder %v1587_v52, 0.0  ;;  %v1799_v34 = vmul.f32 %v3110_v38, %v1587_v52 }
 0x424   :  { %1894 = vst [vmem:[#allocation10 + $0x50] sm:$0xff] %v1846_v8  ;;  %v1844_v1 = vsel %vm1742_vm9, %v1576_v16, %v1796_v9  ;;  %vm1743_vm11 = vcmp.gt.f32.partialorder %v1579_v51, 0.0  ;;  %v1797_v53 = vmul.f32 %v3110_v38, %v1579_v51 }
 0x425   :  { %1892 = vst [vmem:[#allocation10 + $0x40] sm:$0xff] %v1844_v1  ;;  %v1847_v12 = vsel %vm1745_vm10, %v1587_v52, %v1799_v34 }
 0x426   :  { %1895 = vst [vmem:[#allocation10 + $0x58] sm:$0xff] %v1847_v12  ;;  %v1845_v35 = vsel %vm1743_vm11, %v1579_v51, %v1797_v53  ;;  %v2433_v25 = vpop.f32.mrb[76].mxu0 }
 0x427   :  { %1893 = vst [vmem:[#allocation10 + $0x48] sm:$0xff] %v1845_v35  ;;  %v1600_v19 = vadd.f32 %v2433_v25, %v3105_v33  ;;  %v1591_v58 = vpop.f32.mrb[77].mxu0 }
 0x428   :  { %v1592_v59 = vadd.f32 %v3105_v33, %v1591_v58  ;;  %v2434_v4 = vpop.f32.mrb[78].mxu0 }
 0x429   :  { %vm1748_vm12 = vcmp.gt.f32.partialorder %v1600_v19, 0.0  ;;  %v1802_v5 = vmul.f32 %v3110_v38, %v1600_v19  ;;  %v1603_v14 = vadd.f32 %v2434_v4, %v3105_v33  ;;  %v1594_v15 = vpop.f32.mrb[79].mxu0 }
 0x42a   :  { %vm1746_vm13 = vcmp.gt.f32.partialorder %v1592_v59, 0.0  ;;  %v1800_v27 = vmul.f32 %v3110_v38, %v1592_v59  ;;  %v1595_v28 = vadd.f32 %v3105_v33, %v1594_v15 }
 0x42b   :  { %v1850_v29 = vsel %vm1748_vm12, %v1600_v19, %v1802_v5  ;;  %vm1749_vm14 = vcmp.gt.f32.partialorder %v1603_v14, 0.0  ;;  %v1803_v30 = vmul.f32 %v3110_v38, %v1603_v14 }
 0x42c   :  { %1898 = vst [vmem:[#allocation10 + $0x70] sm:$0xff] %v1850_v29  ;;  %v1848_v31 = vsel %vm1746_vm13, %v1592_v59, %v1800_v27  ;;  %vm1747_vm15 = vcmp.gt.f32.partialorder %v1595_v28, 0.0  ;;  %v1801_v32 = vmul.f32 %v3110_v38, %v1595_v28 }
 0x42d   :  { %1896 = vst [vmem:[#allocation10 + $0x60] sm:$0xff] %v1848_v31  ;;  %v1851_v26 = vsel %vm1749_vm14, %v1603_v14, %v1803_v30 }
 0x42e   :  { %1899 = vst [vmem:[#allocation10 + $0x78] sm:$0xff] %v1851_v26  ;;  %v1849_v13 = vsel %vm1747_vm15, %v1595_v28, %v1801_v32  ;;  %v2437_v23 = vpop.f32.mrb[80].mxu0 }
 0x42f   :  { %1897 = vst [vmem:[#allocation10 + $0x68] sm:$0xff] %v1849_v13  ;;  %v1616_v47 = vadd.f32 %v2437_v23, %v3105_v33  ;;  %v1607_v10 = vpop.f32.mrb[81].mxu0 }
 0x430   :  { %v1608_v21 = vadd.f32 %v3105_v33, %v1607_v10  ;;  %v2438_v36 = vpop.f32.mrb[82].mxu0 }
 0x431   :  { %vm1752_vm0 = vcmp.gt.f32.partialorder %v1616_v47, 0.0  ;;  %v1806_v41 = vmul.f32 %v3110_v38, %v1616_v47  ;;  %v1619_v56 = vadd.f32 %v2438_v36, %v3105_v33  ;;  %v1610_v0 = vpop.f32.mrb[83].mxu0 }
 0x432   :  { %vm1750_vm1 = vcmp.gt.f32.partialorder %v1608_v21, 0.0  ;;  %v1804_v3 = vmul.f32 %v3110_v38, %v1608_v21  ;;  %v1611_v40 = vadd.f32 %v3105_v33, %v1610_v0 }
 0x433   :  { %v1854_v17 = vsel %vm1752_vm0, %v1616_v47, %v1806_v41  ;;  %vm1753_vm2 = vcmp.gt.f32.partialorder %v1619_v56, 0.0  ;;  %v1807_v6 = vmul.f32 %v3110_v38, %v1619_v56 }
 0x434   :  { %1902 = vst [vmem:[#allocation10 + $0x90] sm:$0xff] %v1854_v17  ;;  %v1852_v42 = vsel %vm1750_vm1, %v1608_v21, %v1804_v3  ;;  %vm1751_vm3 = vcmp.gt.f32.partialorder %v1611_v40, 0.0  ;;  %v1805_v44 = vmul.f32 %v3110_v38, %v1611_v40 }
 0x435   :  { %1900 = vst [vmem:[#allocation10 + $0x80] sm:$0xff] %v1852_v42  ;;  %v1855_v45 = vsel %vm1753_vm2, %v1619_v56, %v1807_v6 }
 0x436   :  { %1903 = vst [vmem:[#allocation10 + $0x98] sm:$0xff] %v1855_v45  ;;  %v1853_v39 = vsel %vm1751_vm3, %v1611_v40, %v1805_v44  ;;  %v2441_v54 = vpop.f32.mrb[84].mxu0 }
 0x437   :  { %1901 = vst [vmem:[#allocation10 + $0x88] sm:$0xff] %v1853_v39  ;;  %v1632_v57 = vadd.f32 %v2441_v54, %v3105_v33  ;;  %v1623_v22 = vpop.f32.mrb[85].mxu0 }
 0x438   :  { %v1624_v24 = vadd.f32 %v3105_v33, %v1623_v22  ;;  %v2442_v63 = vpop.f32.mrb[86].mxu0 }
 0x439   :  { %vm1756_vm4 = vcmp.gt.f32.partialorder %v1632_v57, 0.0  ;;  %v1810_v55 = vmul.f32 %v3110_v38, %v1632_v57  ;;  %v1635_v61 = vadd.f32 %v2442_v63, %v3105_v33  ;;  %v1626_v7 = vpop.f32.mrb[87].mxu0 }
 0x43a   :  { %vm1754_vm5 = vcmp.gt.f32.partialorder %v1624_v24, 0.0  ;;  %v1808_v46 = vmul.f32 %v3110_v38, %v1624_v24  ;;  %v1627_v62 = vadd.f32 %v3105_v33, %v1626_v7 }
 0x43b   :  { %v1858_v2 = vsel %vm1756_vm4, %v1632_v57, %v1810_v55  ;;  %vm1757_vm6 = vcmp.gt.f32.partialorder %v1635_v61, 0.0  ;;  %v1811_v37 = vmul.f32 %v3110_v38, %v1635_v61 }
 0x43c   :  { %1906 = vst [vmem:[#allocation10 + $0xb0] sm:$0xff] %v1858_v2  ;;  %v1856_v49 = vsel %vm1754_vm5, %v1624_v24, %v1808_v46  ;;  %vm1755_vm7 = vcmp.gt.f32.partialorder %v1627_v62, 0.0  ;;  %v1809_v20 = vmul.f32 %v3110_v38, %v1627_v62 }
 0x43d   :  { %1904 = vst [vmem:[#allocation10 + $0xa0] sm:$0xff] %v1856_v49  ;;  %v1859_v50 = vsel %vm1757_vm6, %v1635_v61, %v1811_v37 }
 0x43e   :  { %1907 = vst [vmem:[#allocation10 + $0xb8] sm:$0xff] %v1859_v50  ;;  %v1857_v11 = vsel %vm1755_vm7, %v1627_v62, %v1809_v20  ;;  %v2445_v48 = vpop.f32.mrb[64].mxu1 }
 0x43f   :  { %1905 = vst [vmem:[#allocation10 + $0xa8] sm:$0xff] %v1857_v11  ;;  %v1648_v16 = vadd.f32 %v2445_v48, %v3105_v33  ;;  %v1639_v43 = vpop.f32.mrb[65].mxu1 }
 0x440   :  { %v1640_v60 = vadd.f32 %v3105_v33, %v1639_v43  ;;  %v2446_v52 = vpop.f32.mrb[66].mxu1 }
 0x441   :  { %vm1760_vm8 = vcmp.gt.f32.partialorder %v1648_v16, 0.0  ;;  %v1814_v18 = vmul.f32 %v3110_v38, %v1648_v16  ;;  %v1651_v9 = vadd.f32 %v2446_v52, %v3105_v33  ;;  %v1642_v51 = vpop.f32.mrb[67].mxu1 }
 0x442   :  { %vm1758_vm9 = vcmp.gt.f32.partialorder %v1640_v60, 0.0  ;;  %v1812_v8 = vmul.f32 %v3110_v38, %v1640_v60  ;;  %v1643_v34 = vadd.f32 %v3105_v33, %v1642_v51 }
 0x443   :  { %v1862_v1 = vsel %vm1760_vm8, %v1648_v16, %v1814_v18  ;;  %vm1761_vm10 = vcmp.gt.f32.partialorder %v1651_v9, 0.0  ;;  %v1815_v53 = vmul.f32 %v3110_v38, %v1651_v9 }
 0x444   :  { %1910 = vst [vmem:[#allocation10 + $0xd0] sm:$0xff] %v1862_v1  ;;  %v1860_v12 = vsel %vm1758_vm9, %v1640_v60, %v1812_v8  ;;  %vm1759_vm11 = vcmp.gt.f32.partialorder %v1643_v34, 0.0  ;;  %v1813_v35 = vmul.f32 %v3110_v38, %v1643_v34 }
 0x445   :  { %1908 = vst [vmem:[#allocation10 + $0xc0] sm:$0xff] %v1860_v12  ;;  %v1863_v25 = vsel %vm1761_vm10, %v1651_v9, %v1815_v53 }
 0x446   :  { %1911 = vst [vmem:[#allocation10 + $0xd8] sm:$0xff] %v1863_v25  ;;  %v1861_v19 = vsel %vm1759_vm11, %v1643_v34, %v1813_v35  ;;  %v2449_v58 = vpop.f32.mrb[68].mxu1 }
 0x447   :  { %1909 = vst [vmem:[#allocation10 + $0xc8] sm:$0xff] %v1861_v19  ;;  %v1664_v59 = vadd.f32 %v2449_v58, %v3105_v33  ;;  %v1655_v4 = vpop.f32.mrb[69].mxu1 }
 0x448   :  { %v1656_v5 = vadd.f32 %v3105_v33, %v1655_v4  ;;  %v2450_v14 = vpop.f32.mrb[70].mxu1 }
 0x449   :  { %vm1764_vm12 = vcmp.gt.f32.partialorder %v1664_v59, 0.0  ;;  %v1818_v15 = vmul.f32 %v3110_v38, %v1664_v59  ;;  %v1667_v27 = vadd.f32 %v2450_v14, %v3105_v33  ;;  %v1658_v28 = vpop.f32.mrb[71].mxu1 }
 0x44a   :  { %vm1762_vm13 = vcmp.gt.f32.partialorder %v1656_v5, 0.0  ;;  %v1816_v29 = vmul.f32 %v3110_v38, %v1656_v5  ;;  %v1659_v30 = vadd.f32 %v3105_v33, %v1658_v28 }
 0x44b   :  { %v1866_v31 = vsel %vm1764_vm12, %v1664_v59, %v1818_v15  ;;  %vm1765_vm14 = vcmp.gt.f32.partialorder %v1667_v27, 0.0  ;;  %v1819_v32 = vmul.f32 %v3110_v38, %v1667_v27 }
 0x44c   :  { %1914 = vst [vmem:[#allocation10 + $0xf0] sm:$0xff] %v1866_v31  ;;  %v1864_v26 = vsel %vm1762_vm13, %v1656_v5, %v1816_v29  ;;  %vm1763_vm15 = vcmp.gt.f32.partialorder %v1659_v30, 0.0  ;;  %v1817_v13 = vmul.f32 %v3110_v38, %v1659_v30 }
 0x44d   :  { %1912 = vst [vmem:[#allocation10 + $0xe0] sm:$0xff] %v1864_v26  ;;  %v1867_v23 = vsel %vm1765_vm14, %v1667_v27, %v1819_v32 }
 0x44e   :  { %1915 = vst [vmem:[#allocation10 + $0xf8] sm:$0xff] %v1867_v23  ;;  %v1865_v47 = vsel %vm1763_vm15, %v1659_v30, %v1817_v13  ;;  %v2453_v10 = vpop.f32.mrb[72].mxu1 }
 0x44f   :  { %1913 = vst [vmem:[#allocation10 + $0xe8] sm:$0xff] %v1865_v47  ;;  %v1680_v21 = vadd.f32 %v2453_v10, %v3105_v33  ;;  %v1671_v36 = vpop.f32.mrb[73].mxu1 }
 0x450   :  { %v1672_v41 = vadd.f32 %v3105_v33, %v1671_v36  ;;  %v2454_v56 = vpop.f32.mrb[74].mxu1 }
 0x451   :  { %vm1768_vm0 = vcmp.gt.f32.partialorder %v1680_v21, 0.0  ;;  %v1822_v0 = vmul.f32 %v3110_v38, %v1680_v21  ;;  %v1683_v3 = vadd.f32 %v2454_v56, %v3105_v33  ;;  %v1674_v40 = vpop.f32.mrb[75].mxu1 }
 0x452   :  { %vm1766_vm1 = vcmp.gt.f32.partialorder %v1672_v41, 0.0  ;;  %v1820_v17 = vmul.f32 %v3110_v38, %v1672_v41  ;;  %v1675_v6 = vadd.f32 %v3105_v33, %v1674_v40 }
 0x453   :  { %v1870_v42 = vsel %vm1768_vm0, %v1680_v21, %v1822_v0  ;;  %vm1769_vm2 = vcmp.gt.f32.partialorder %v1683_v3, 0.0  ;;  %v1823_v44 = vmul.f32 %v3110_v38, %v1683_v3 }
 0x454   :  { %1918 = vst [vmem:[#allocation10 + $0x110] sm:$0xff] %v1870_v42  ;;  %v1868_v45 = vsel %vm1766_vm1, %v1672_v41, %v1820_v17  ;;  %vm1767_vm3 = vcmp.gt.f32.partialorder %v1675_v6, 0.0  ;;  %v1821_v39 = vmul.f32 %v3110_v38, %v1675_v6 }
 0x455   :  { %1916 = vst [vmem:[#allocation10 + $0x100] sm:$0xff] %v1868_v45  ;;  %v1871_v54 = vsel %vm1769_vm2, %v1683_v3, %v1823_v44 }
 0x456   :  { %1919 = vst [vmem:[#allocation10 + $0x118] sm:$0xff] %v1871_v54  ;;  %v1869_v57 = vsel %vm1767_vm3, %v1675_v6, %v1821_v39  ;;  %v2457_v22 = vpop.f32.mrb[76].mxu1 }
 0x457   :  { %1917 = vst [vmem:[#allocation10 + $0x108] sm:$0xff] %v1869_v57  ;;  %v1696_v24 = vadd.f32 %v2457_v22, %v3105_v33  ;;  %v1687_v63 = vpop.f32.mrb[77].mxu1 }
 0x458   :  { %v1688_v55 = vadd.f32 %v3105_v33, %v1687_v63  ;;  %v2458_v61 = vpop.f32.mrb[78].mxu1 }
 0x459   :  { %vm1772_vm4 = vcmp.gt.f32.partialorder %v1696_v24, 0.0  ;;  %v1826_v7 = vmul.f32 %v3110_v38, %v1696_v24  ;;  %v1699_v46 = vadd.f32 %v2458_v61, %v3105_v33  ;;  %v1690_v62 = vpop.f32.mrb[79].mxu1 }
 0x45a   :  { %vm1770_vm5 = vcmp.gt.f32.partialorder %v1688_v55, 0.0  ;;  %v1824_v2 = vmul.f32 %v3110_v38, %v1688_v55  ;;  %v1691_v37 = vadd.f32 %v3105_v33, %v1690_v62 }
 0x45b   :  { %v1874_v49 = vsel %vm1772_vm4, %v1696_v24, %v1826_v7  ;;  %vm1773_vm6 = vcmp.gt.f32.partialorder %v1699_v46, 0.0  ;;  %v1827_v20 = vmul.f32 %v3110_v38, %v1699_v46 }
 0x45c   :  { %1922 = vst [vmem:[#allocation10 + $0x130] sm:$0xff] %v1874_v49  ;;  %v1872_v50 = vsel %vm1770_vm5, %v1688_v55, %v1824_v2  ;;  %vm1771_vm7 = vcmp.gt.f32.partialorder %v1691_v37, 0.0  ;;  %v1825_v11 = vmul.f32 %v3110_v38, %v1691_v37 }
 0x45d   :  { %1920 = vst [vmem:[#allocation10 + $0x120] sm:$0xff] %v1872_v50  ;;  %v1875_v48 = vsel %vm1773_vm6, %v1699_v46, %v1827_v20 }
 0x45e   :  { %1923 = vst [vmem:[#allocation10 + $0x138] sm:$0xff] %v1875_v48  ;;  %v1873_v16 = vsel %vm1771_vm7, %v1691_v37, %v1825_v11  ;;  %v2461_v43 = vpop.f32.mrb[80].mxu1 }
 0x45f   :  { %1921 = vst [vmem:[#allocation10 + $0x128] sm:$0xff] %v1873_v16  ;;  %v1712_v60 = vadd.f32 %v2461_v43, %v3105_v33  ;;  %v1703_v52 = vpop.f32.mrb[81].mxu1 }
 0x460   :  { %v1704_v18 = vadd.f32 %v3105_v33, %v1703_v52  ;;  %v2462_v9 = vpop.f32.mrb[82].mxu1 }
 0x461   :  { %vm1776_vm8 = vcmp.gt.f32.partialorder %v1712_v60, 0.0  ;;  %v1830_v51 = vmul.f32 %v3110_v38, %v1712_v60  ;;  %v1715_v8 = vadd.f32 %v2462_v9, %v3105_v33  ;;  %v1706_v34 = vpop.f32.mrb[83].mxu1 }
 0x462   :  { %vm1774_vm9 = vcmp.gt.f32.partialorder %v1704_v18, 0.0  ;;  %v1828_v1 = vmul.f32 %v3110_v38, %v1704_v18  ;;  %v1707_v53 = vadd.f32 %v3105_v33, %v1706_v34 }
 0x463   :  { %v1878_v12 = vsel %vm1776_vm8, %v1712_v60, %v1830_v51  ;;  %vm1777_vm10 = vcmp.gt.f32.partialorder %v1715_v8, 0.0  ;;  %v1831_v35 = vmul.f32 %v3110_v38, %v1715_v8 }
 0x464   :  { %1926 = vst [vmem:[#allocation10 + $0x150] sm:$0xff] %v1878_v12  ;;  %v1876_v25 = vsel %vm1774_vm9, %v1704_v18, %v1828_v1  ;;  %vm1775_vm11 = vcmp.gt.f32.partialorder %v1707_v53, 0.0  ;;  %v1829_v19 = vmul.f32 %v3110_v38, %v1707_v53 }
 0x465   :  { %1924 = vst [vmem:[#allocation10 + $0x140] sm:$0xff] %v1876_v25  ;;  %v1879_v58 = vsel %vm1777_vm10, %v1715_v8, %v1831_v35 }
 0x466   :  { %1927 = vst [vmem:[#allocation10 + $0x158] sm:$0xff] %v1879_v58  ;;  %v1877_v59 = vsel %vm1775_vm11, %v1707_v53, %v1829_v19  ;;  %v2465_v4 = vpop.f32.mrb[84].mxu1 }
 0x467   :  { %1925 = vst [vmem:[#allocation10 + $0x148] sm:$0xff] %v1877_v59  ;;  %v1728_v5 = vadd.f32 %v2465_v4, %v3105_v33  ;;  %v1719_v14 = vpop.f32.mrb[85].mxu1 }
 0x468   :  { %v1720_v15 = vadd.f32 %v3105_v33, %v1719_v14  ;;  %v2466_v27 = vpop.f32.mrb[86].mxu1 }
 0x469   :  { %vm1780_vm12 = vcmp.gt.f32.partialorder %v1728_v5, 0.0  ;;  %v1834_v28 = vmul.f32 %v3110_v38, %v1728_v5  ;;  %v1731_v29 = vadd.f32 %v2466_v27, %v3105_v33  ;;  %v1722_v30 = vpop.f32.mrb[87].mxu1 }
 0x46a   :  { %vm1778_vm13 = vcmp.gt.f32.partialorder %v1720_v15, 0.0  ;;  %v1832_v31 = vmul.f32 %v3110_v38, %v1720_v15  ;;  %v1723_v32 = vadd.f32 %v3105_v33, %v1722_v30 }
 0x46b   :  { %v1882_v26 = vsel %vm1780_vm12, %v1728_v5, %v1834_v28  ;;  %vm1781_vm14 = vcmp.gt.f32.partialorder %v1731_v29, 0.0  ;;  %v1835_v13 = vmul.f32 %v3110_v38, %v1731_v29 }
 0x46c   :  { %1930 = vst [vmem:[#allocation10 + $0x170] sm:$0xff] %v1882_v26  ;;  %v1880_v23 = vsel %vm1778_vm13, %v1720_v15, %v1832_v31  ;;  %vm1779_vm15 = vcmp.gt.f32.partialorder %v1723_v32, 0.0  ;;  %v1833_v47 = vmul.f32 %v3110_v38, %v1723_v32 }
 0x46d   :  { %1928 = vst [vmem:[#allocation10 + $0x160] sm:$0xff] %v1880_v23  ;;  %v1883_v10 = vsel %vm1781_vm14, %v1731_v29, %v1835_v13 }
 0x46e   :  { %1931 = vst [vmem:[#allocation10 + $0x178] sm:$0xff] %v1883_v10  ;;  %v1881_v21 = vsel %vm1779_vm15, %v1723_v32, %v1833_v47 }
 0x46f   :  { %1929 = vst [vmem:[#allocation10 + $0x168] sm:$0xff] %v1881_v21 }
 0x470   :  { %2647 = shalt.err (!%p2644_p8)
}
 0x471   :  { %s2648_s16 = scalar_lea.hbm %s3228_s8, 6144 }
 0x472   :  { %p2649_p9 = scmp.ne.s32.totalorder %s3228_s8, %s2648_s16  ;;  %p2652_p10 = scmp.lt.u32.totalorder %s2648_s16, %s3228_s8 }
 0x474   :  { %p2654_p11 = pnand %p2652_p10, %p2649_p9 }
 0x476   :  { %2657 = shalt.err (!%p2654_p11)
}
 0x477   :  { %s2673_s30 = smov 128   ;;  %s2674_s22 = smov 8  }
 0x478   :  { %1943 = dma.vmem_to_hbm [thread:$0]  %s1938_s7, 6144, %s3228_s8, [#allocation4], %s2673_s30, %s2673_s30, %s2674_s22  }
 0x479   :  { %2664 = dma.done.wait [#allocation4], 6144  }
 0x47a   :  { %2665 = vsyncadd [#allocation4], 4294961152 }
 0x47b   :  { %1947 = vsyncpa [#allocation3], 1 }
 0x47c   :  { %1948 = vsyncpa [#allocation6], 1 }
 0x47d   :  { %1949 = vsyncpa [#allocation9], 1 }
 0x47e   :  { %1950 = vsyncpa [#allocation4], 1 }

</bundles_post_ra>
